<compile_context>
chip_gen: v6e
topology: v6e:2x2x1
jax: 0.10.0
libtpu: 0.0.40
codegen_flags: <defaults>
</compile_context>

<pallas_src>
from functools import partial

import jax
import jax.numpy as jnp
from jax.experimental import pallas as pl
from jax.experimental.pallas import tpu as pltpu

GRID_SIZE = 5
SPLINE_ORDER = 5
GRID_RANGE = (-1.0, 1.0)
SUB_B = 8  # sub-chunk (sublane) height for the basis recursion


def _round_up(n, m):
    return (n + m - 1) // m * m


def _rinv_offset(k, t, G):
    """Row index of 1/(grid[t+k] - grid[t]) in the packed reciprocal table."""
    return sum(G - j for j in range(1, k)) + t


# ----------------------------------------------------------------------------
# Kernel
# ----------------------------------------------------------------------------
def _kan_kernel(x_ref, grid_ref, rinv_ref, w_ref, out_ref, bases_ref, *,
                grid_size, spline_order, sub_b):
    """x_ref:    (TILE_B, I)          native dtype  (I = lane-padded in_features)
       grid_ref: (G, I)               f32   G = grid_size + 2*spline_order + 1
       rinv_ref: (R, I)               f32   precomputed 1/(g[t+k]-g[t])
       w_ref:    ((K+1)*I, TILE_O)    f32/bf16  [base_w.T ; spline_w (k-major)]
       out_ref:  (TILE_B, TILE_O)
       bases_ref (scratch): (TILE_B, (K+1)*I) in w_ref.dtype
    """
    G = grid_ref.shape[0]
    tile_b, I = x_ref.shape
    K = grid_size + spline_order

    # The bases scratch only depends on the batch tile -> recompute it only for
    # the first output tile (o is the inner, "arbitrary" grid axis).
    @pl.when(pl.program_id(1) == 0)
    def _fill_bases():
        # Fully-unrolled sub-chunk loop: static row offsets -> aligned stores,
        # and each chunk's live set is bounded to ~2*G (sub_b, 128) tiles.
        for c in range(tile_b // sub_b):
            r0 = c * sub_b
            x = x_ref[pl.ds(r0, sub_b), :].astype(jnp.float32)

            # Base-activation block (ReLU) occupies columns [0, I).
            bases_ref[pl.ds(r0, sub_b), pl.ds(0, I)] = \
                jnp.maximum(x, 0.0).astype(bases_ref.dtype)

            # Hoisted knot differences d[t] = x - g[t].
            d = [x - grid_ref[t, :] for t in range(G)]

            # Order-0 indicator bases on half-open intervals [g_t, g_{t+1}).
            b = [((d[t] >= 0.0) & (d[t + 1] < 0.0)).astype(jnp.float32)
                 for t in range(G - 1)]

            # Cox-de Boor recursion.  Denominators are x-independent, so the
            # precomputed reciprocals turn divides into multiplies; the right
            # coefficient uses the exact identity 1 - u[t+1].
            for k in range(1, spline_order + 1):
                u = [d[t] * rinv_ref[_rinv_offset(k, t, G), :]
                     for t in range(G - k)]
                b = [u[t] * b[t] + (1.0 - u[t + 1]) * b[t + 1]
                     for t in range(G - 1 - k)]
            # len(b) == K

            for t in range(K):
                bases_ref[pl.ds(r0, sub_b), pl.ds((t + 1) * I, I)] = \
                    b[t].astype(bases_ref.dtype)

    # Single fused MXU matmul over the (K+1)*I contraction, f32 accumulation.
    out_ref[...] = jnp.dot(bases_ref[...], w_ref[...],
                           preferred_element_type=jnp.float32).astype(out_ref.dtype)


# ----------------------------------------------------------------------------
# One-time parameter preparation (do NOT run this per forward call)
# ----------------------------------------------------------------------------
def prepare_kan_params(grid, base_weight, spline_weight, spline_scaler=None, *,
                       grid_size=GRID_SIZE, spline_order=SPLINE_ORDER,
                       dtype=jnp.bfloat16):
    """grid: (I, G); base_weight: (O, I); spline_weight: (O, I, K);
    spline_scaler: (O, I) or None.  Returns a params dict for the forward."""
    O, I, K = spline_weight.shape
    assert K == grid_size + spline_order
    G = grid.shape[1]
    I_pad = _round_up(I, 128)

    grid_gi = jnp.asarray(grid, jnp.float32).T                       # (G, I)
    if I_pad > I:
        # Replicate the last real lane so padded-lane knot differences stay
        # finite; their weight rows are zero, so they never reach the output.
        grid_gi = jnp.pad(grid_gi, ((0, 0), (0, I_pad - I)), mode="edge")

    # Packed reciprocals of knot differences: row (k, t) = 1/(g[t+k] - g[t]).
    # TODO(synk): adaptive (update_grid-style) grids with duplicate knots would
    # make these inf; clamp knot spacing if non-uniform grids are supported.
    rows = []
    for k in range(1, spline_order + 1):
        for t in range(G - k):
            rows.append(1.0 / (grid_gi[t + k] - grid_gi[t]))
    rinv = jnp.stack(rows, axis=0)                                   # (R, I_pad)

    base_w = jnp.asarray(base_weight, jnp.float32)                   # (O, I)
    scaled = jnp.asarray(spline_weight, jnp.float32)
    if spline_scaler is not None:
        scaled = scaled * jnp.asarray(spline_scaler, jnp.float32)[:, :, None]
    if I_pad > I:
        base_w = jnp.pad(base_w, ((0, 0), (0, I_pad - I)))
        scaled = jnp.pad(scaled, ((0, 0), (0, I_pad - I), (0, 0)))

    # [base_w.T ; spline_w (k-major)] so the kernel does ONE fused matmul.
    w_spline = jnp.transpose(scaled, (2, 1, 0)).reshape(K * I_pad, O)
    w_full = jnp.concatenate([base_w.T, w_spline], axis=0)           # ((K+1)*I_pad, O)

    # Lane-dense output: pad O to a multiple of 128 with zero columns.
    O_pad = _round_up(O, 128)
    if O_pad > O:
        w_full = jnp.pad(w_full, ((0, 0), (0, O_pad - O)))
    w_full = w_full.astype(dtype)

    return {
        "grid": grid_gi, "rinv": rinv, "w": w_full,
        "in_features": I, "in_features_padded": I_pad, "out_features": O,
        "grid_size": grid_size, "spline_order": spline_order,
    }


# ----------------------------------------------------------------------------
# Forward
# ----------------------------------------------------------------------------
def _vmem_budget_bytes():
    try:
        cap = int(pltpu.get_tpu_info().vmem_capacity_bytes)
    except Exception:
        cap = 64 * 1024 * 1024
    # ~96 MiB on v5e/v6e (128 MiB physical), ~48 MiB on v7x (64 MiB physical).
    return max(32 << 20, min(int(cap * 0.75), cap - (16 << 20)))


def kan_linear_forward(x, params, *, tile_b=None, max_tile_o=None,
                       interpret=False):
    """x: (B, in_features) -> (B, out_features)."""
    grid_gi = params["grid"]
    rinv = params["rinv"]
    w_full = params["w"]
    I = params["in_features"]
    I_pad = params["in_features_padded"]
    O = params["out_features"]
    grid_size = params["grid_size"]
    spline_order = params["spline_order"]
    K = grid_size + spline_order

    B, I_in = x.shape
    assert I_in == I
    KI, O_pad = w_full.shape
    assert KI == (K + 1) * I_pad

    vmem_limit = _vmem_budget_bytes()

    # ---- batch tiling ----
    if tile_b is None:
        # Bigger batch tiles on 128 MiB-VMEM parts (v5e/v6e) for large batches.
        tile_b = 256 if (vmem_limit >= (80 << 20) and B >= 512) else 128
    tile_b = _round_up(min(tile_b, _round_up(B, SUB_B)), SUB_B)
    B_pad = _round_up(B, tile_b)
    # Expose >= 2 batch tiles when possible so the "parallel" batch axis can be
    # sharded across both v7x TensorCores (harmless on v5e/v6e).
    while B_pad // tile_b < 2 and tile_b >= 2 * SUB_B:
        tile_b = _round_up(tile_b // 2, SUB_B)
        B_pad = _round_up(B, tile_b)

    # ---- output tiling: keep the weight resident in VMEM when it fits ----
    itemsize_w = jnp.dtype(w_full.dtype).itemsize
    itemsize_x = jnp.dtype(x.dtype).itemsize
    scratch_bytes = tile_b * KI * itemsize_w
    const_bytes = 2 * 4 * (grid_gi.size + rinv.size)

    def _fits(to):
        need = (2 * KI * to * itemsize_w            # double-buffered weight tile
                + 2 * tile_b * I_pad * itemsize_x   # double-buffered x tile
                + 2 * tile_b * to * itemsize_x      # double-buffered out tile
                + scratch_bytes + const_bytes)
        return need <= 0.7 * vmem_limit

    cand = [O_pad] + [t for t in (512, 256, 128) if t < O_pad and O_pad % t == 0]
    if max_tile_o is not None:
        cand = [t for t in cand if t <= max(max_tile_o, 128)] or [128]
    tile_o = cand[-1]
    for t in cand:
        if _fits(t):
            tile_o = t
            break

    # ---- pad x only when required (no dtype cast in the wrapper) ----
    if B_pad > B or I_pad > I:
        x_p = jnp.pad(x, ((0, B_pad - B), (0, I_pad - I)))
    else:
        x_p = x

    kernel = partial(_kan_kernel, grid_size=grid_size,
                     spline_order=spline_order, sub_b=SUB_B)

    out_pad = pl.pallas_call(
        kernel,
        out_shape=jax.ShapeDtypeStruct((B_pad, O_pad), x.dtype),
        grid=(B_pad // tile_b, O_pad // tile_o),
        in_specs=[
            pl.BlockSpec((tile_b, I_pad), lambda b, o: (b, 0)),
            pl.BlockSpec(grid_gi.shape, lambda b, o: (0, 0)),
            pl.BlockSpec(rinv.shape, lambda b, o: (0, 0)),
            pl.BlockSpec((KI, tile_o), lambda b, o: (0, o)),
        ],
        out_specs=pl.BlockSpec((tile_b, tile_o), lambda b, o: (b, o)),
        scratch_shapes=[pltpu.VMEM((tile_b, KI), w_full.dtype)],
        compiler_params=pltpu.CompilerParams(
            dimension_semantics=("parallel", "arbitrary"),
            vmem_limit_bytes=int(vmem_limit),
        ),
        interpret=interpret,
    )(x_p, grid_gi, rinv, w_full)

    return out_pad[:B, :O]


# ----------------------------------------------------------------------------
# Pure-JAX reference (mirrors the PyTorch forward verbatim)
# ----------------------------------------------------------------------------
def ref_forward(x, grid, base_weight, spline_weight, spline_scaler,
                *, grid_size=GRID_SIZE, spline_order=SPLINE_ORDER):
    xg = x[:, :, None]
    bases = ((xg >= grid[:, :-1]) & (xg < grid[:, 1:])).astype(x.dtype)
    for k in range(1, spline_order + 1):
        bases = ((xg - grid[:, :-(k + 1)])
                 / (grid[:, k:-1] - grid[:, :-(k + 1)]) * bases[:, :, :-1]
                 + (grid[:, k + 1:] - xg)
                 / (grid[:, k + 1:] - grid[:, 1:-k]) * bases[:, :, 1:])
    base_out = jnp.maximum(x, 0.0) @ base_weight.T
    scaled = spline_weight * spline_scaler[:, :, None]
    spline_out = bases.reshape(x.shape[0], -1) @ scaled.reshape(scaled.shape[0], -1).T
    return base_out + spline_out


if __name__ == "__main__":
    batch, in_features, out_features = 8, 32, 16
    K = GRID_SIZE + SPLINE_ORDER

    # Grid buffer exactly as in KANLinear.__init__:
    h = (GRID_RANGE[1] - GRID_RANGE[0]) / GRID_SIZE
    grid_1d = (jnp.arange(-SPLINE_ORDER, GRID_SIZE + SPLINE_ORDER + 1,
                          dtype=jnp.float32) * h + GRID_RANGE[0])
    grid = jnp.broadcast_to(grid_1d, (in_features, grid_1d.shape[0]))

    # Deterministic synthetic parameters (shapes from __init__).
    # TODO(synk): torch.linalg.lstsq-based curve2coeff init / update_grid not replicated.
    key = jax.random.PRNGKey(0)
    kx, kb, ks, kc = jax.random.split(key, 4)
    x = jax.random.uniform(kx, (batch, in_features), jnp.float32,
                           minval=-0.95, maxval=0.95)
    base_weight = jax.random.uniform(kb, (out_features, in_features),
                                     jnp.float32, minval=-0.3, maxval=0.3)
    spline_weight = jax.random.uniform(ks, (out_features, in_features, K),
                                       jnp.float32, minval=-0.1, maxval=0.1)
    spline_scaler = jax.random.uniform(kc, (out_features, in_features),
                                       jnp.float32, minval=-0.3, maxval=0.3)

    ref = jax.block_until_ready(
        ref_forward(x, grid, base_weight, spline_weight, spline_scaler))

    # Default path: bf16 weights + bf16 bases scratch, f32 MXU accumulation.
    params_bf16 = prepare_kan_params(grid, base_weight, spline_weight,
                                     spline_scaler)
    out_bf16 = jax.block_until_ready(kan_linear_forward(x, params_bf16))
    assert out_bf16.shape == (batch, out_features)
    assert jnp.allclose(out_bf16, ref, atol=5e-2, rtol=5e-2), \
        f"bf16 max abs err {jnp.max(jnp.abs(out_bf16 - ref))}"

    # f32 debug path (tight tolerance).
    params_f32 = prepare_kan_params(grid, base_weight, spline_weight,
                                    spline_scaler, dtype=jnp.float32)
    out_f32 = jax.block_until_ready(kan_linear_forward(x, params_f32))
    assert jnp.allclose(out_f32, ref, atol=3e-4, rtol=3e-4), \
        f"f32 max abs err {jnp.max(jnp.abs(out_f32 - ref))}"

    # Exercise the streamed-weight (multi output-tile, multi batch-tile) path.
    b2, i2, o2 = 32, 32, 144
    kx2, kb2, ks2, kc2 = jax.random.split(jax.random.PRNGKey(1), 4)
    grid2 = jnp.broadcast_to(grid_1d, (i2, grid_1d.shape[0]))
    x2 = jax.random.uniform(kx2, (b2, i2), jnp.float32, minval=-0.95, maxval=0.95)
    bw2 = jax.random.uniform(kb2, (o2, i2), jnp.float32, minval=-0.3, maxval=0.3)
    sw2 = jax.random.uniform(ks2, (o2, i2, K), jnp.float32, minval=-0.1, maxval=0.1)
    sc2 = jax.random.uniform(kc2, (o2, i2), jnp.float32, minval=-0.3, maxval=0.3)
    ref2 = jax.block_until_ready(ref_forward(x2, grid2, bw2, sw2, sc2))
    params2 = prepare_kan_params(grid2, bw2, sw2, sc2)
    out2 = jax.block_until_ready(kan_linear_forward(x2, params2, max_tile_o=128))
    assert out2.shape == (b2, o2)
    assert jnp.allclose(out2, ref2, atol=5e-2, rtol=5e-2), \
        f"streamed-o max abs err {jnp.max(jnp.abs(out2 - ref2))}"

    print("KERNEL_OK")
</pallas_src>

<mosaic_0001>
module attributes {stable_mosaic.version = 11 : i64} {
  func.func @_kan_kernel(%arg0: i32, %arg1: i32, %arg2: memref<8x128xf32, #tpu.memory_space<vmem>>, %arg3: memref<16x128xf32, #tpu.memory_space<vmem>>, %arg4: memref<65x128xf32, #tpu.memory_space<vmem>>, %arg5: memref<1408x128xbf16, #tpu.memory_space<vmem>>, %arg6: memref<8x128xf32, #tpu.memory_space<vmem>>, %arg7: memref<8x1408xbf16, #tpu.memory_space<vmem>>) attributes {dimension_semantics = [#tpu.dimension_semantics<parallel>, #tpu.dimension_semantics<arbitrary>], iteration_bounds = array<i64: 1, 1>, scalar_prefetch = 0 : i64, scratch_operands = 1 : i64, tpu.core_type = #tpu.core_type<tc>, window_params = [{transform_indices = @transform_0, window_bounds = array<i64: 8, 128>}, {pipeline_mode = #tpu.pipeline_mode<synchronous>, transform_indices = @transform_1, window_bounds = array<i64: 16, 128>}, {pipeline_mode = #tpu.pipeline_mode<synchronous>, transform_indices = @transform_2, window_bounds = array<i64: 65, 128>}, {transform_indices = @transform_3, window_bounds = array<i64: 1408, 128>}, {transform_indices = @transform_4, window_bounds = array<i64: 8, 128>}]} {
    %c0_i32 = arith.constant 0 : i32
    %0 = arith.cmpi eq, %arg1, %c0_i32 : i32
    %1 = arith.extui %0 : i1 to i32
    %c0_i32_0 = arith.constant 0 : i32
    %2 = arith.cmpi ne, %1, %c0_i32_0 : i32
    scf.if %2 {
      %c0_6 = arith.constant 0 : index
      %c0_7 = arith.constant 0 : index
      %7 = vector.load %arg2[%c0_6, %c0_7] : memref<8x128xf32, #tpu.memory_space<vmem>>, vector<8x128xf32>
      %cst_8 = arith.constant 0.000000e+00 : f32
      %8 = vector.broadcast %cst_8 : f32 to vector<8x128xf32>
      %9 = arith.maximumf %7, %8 : vector<8x128xf32>
      %10 = arith.truncf %9 : vector<8x128xf32> to vector<8x128xbf16>
      %c0_9 = arith.constant 0 : index
      %c0_10 = arith.constant 0 : index
      %11 = vector.load %arg7[%c0_9, %c0_10] : memref<8x1408xbf16, #tpu.memory_space<vmem>>, vector<8x128xbf16>
      tpu.vector_store %arg7[%c0_9, %c0_10], %10 {strides = array<i32>} : memref<8x1408xbf16, #tpu.memory_space<vmem>>, vector<8x128xbf16>,
      %c0_11 = arith.constant 0 : index
      %c0_12 = arith.constant 0 : index
      %12 = vector.load %arg3[%c0_11, %c0_12] : memref<16x128xf32, #tpu.memory_space<vmem>>, vector<1x128xf32>
      %13 = vector.shape_cast %12 : vector<1x128xf32> to vector<128xf32>
      %14 = vector.shape_cast %13 : vector<128xf32> to vector<1x128xf32>
      %15 = vector.broadcast %14 : vector<1x128xf32> to vector<8x128xf32>
      %16 = arith.subf %7, %15 : vector<8x128xf32>
      %c1 = arith.constant 1 : index
      %c0_13 = arith.constant 0 : index
      %17 = vector.load %arg3[%c1, %c0_13] : memref<16x128xf32, #tpu.memory_space<vmem>>, vector<1x128xf32>
      %18 = vector.shape_cast %17 : vector<1x128xf32> to vector<128xf32>
      %19 = vector.shape_cast %18 : vector<128xf32> to vector<1x128xf32>
      %20 = vector.broadcast %19 : vector<1x128xf32> to vector<8x128xf32>
      %21 = arith.subf %7, %20 : vector<8x128xf32>
      %c2 = arith.constant 2 : index
      %c0_14 = arith.constant 0 : index
      %22 = vector.load %arg3[%c2, %c0_14] : memref<16x128xf32, #tpu.memory_space<vmem>>, vector<1x128xf32>
      %23 = vector.shape_cast %22 : vector<1x128xf32> to vector<128xf32>
      %24 = vector.shape_cast %23 : vector<128xf32> to vector<1x128xf32>
      %25 = vector.broadcast %24 : vector<1x128xf32> to vector<8x128xf32>
      %26 = arith.subf %7, %25 : vector<8x128xf32>
      %c3 = arith.constant 3 : index
      %c0_15 = arith.constant 0 : index
      %27 = vector.load %arg3[%c3, %c0_15] : memref<16x128xf32, #tpu.memory_space<vmem>>, vector<1x128xf32>
      %28 = vector.shape_cast %27 : vector<1x128xf32> to vector<128xf32>
      %29 = vector.shape_cast %28 : vector<128xf32> to vector<1x128xf32>
      %30 = vector.broadcast %29 : vector<1x128xf32> to vector<8x128xf32>
      %31 = arith.subf %7, %30 : vector<8x128xf32>
      %c4 = arith.constant 4 : index
      %c0_16 = arith.constant 0 : index
      %32 = vector.load %arg3[%c4, %c0_16] : memref<16x128xf32, #tpu.memory_space<vmem>>, vector<1x128xf32>
      %33 = vector.shape_cast %32 : vector<1x128xf32> to vector<128xf32>
      %34 = vector.shape_cast %33 : vector<128xf32> to vector<1x128xf32>
      %35 = vector.broadcast %34 : vector<1x128xf32> to vector<8x128xf32>
      %36 = arith.subf %7, %35 : vector<8x128xf32>
      %c5 = arith.constant 5 : index
      %c0_17 = arith.constant 0 : index
      %37 = vector.load %arg3[%c5, %c0_17] : memref<16x128xf32, #tpu.memory_space<vmem>>, vector<1x128xf32>
      %38 = vector.shape_cast %37 : vector<1x128xf32> to vector<128xf32>
      %39 = vector.shape_cast %38 : vector<128xf32> to vector<1x128xf32>
      %40 = vector.broadcast %39 : vector<1x128xf32> to vector<8x128xf32>
      %41 = arith.subf %7, %40 : vector<8x128xf32>
      %c6 = arith.constant 6 : index
      %c0_18 = arith.constant 0 : index
      %42 = vector.load %arg3[%c6, %c0_18] : memref<16x128xf32, #tpu.memory_space<vmem>>, vector<1x128xf32>
      %43 = vector.shape_cast %42 : vector<1x128xf32> to vector<128xf32>
      %44 = vector.shape_cast %43 : vector<128xf32> to vector<1x128xf32>
      %45 = vector.broadcast %44 : vector<1x128xf32> to vector<8x128xf32>
      %46 = arith.subf %7, %45 : vector<8x128xf32>
      %c7 = arith.constant 7 : index
      %c0_19 = arith.constant 0 : index
      %47 = vector.load %arg3[%c7, %c0_19] : memref<16x128xf32, #tpu.memory_space<vmem>>, vector<1x128xf32>
      %48 = vector.shape_cast %47 : vector<1x128xf32> to vector<128xf32>
      %49 = vector.shape_cast %48 : vector<128xf32> to vector<1x128xf32>
      %50 = vector.broadcast %49 : vector<1x128xf32> to vector<8x128xf32>
      %51 = arith.subf %7, %50 : vector<8x128xf32>
      %c8 = arith.constant 8 : index
      %c0_20 = arith.constant 0 : index
      %52 = vector.load %arg3[%c8, %c0_20] : memref<16x128xf32, #tpu.memory_space<vmem>>, vector<1x128xf32>
      %53 = vector.shape_cast %52 : vector<1x128xf32> to vector<128xf32>
      %54 = vector.shape_cast %53 : vector<128xf32> to vector<1x128xf32>
      %55 = vector.broadcast %54 : vector<1x128xf32> to vector<8x128xf32>
      %56 = arith.subf %7, %55 : vector<8x128xf32>
      %c9 = arith.constant 9 : index
      %c0_21 = arith.constant 0 : index
      %57 = vector.load %arg3[%c9, %c0_21] : memref<16x128xf32, #tpu.memory_space<vmem>>, vector<1x128xf32>
      %58 = vector.shape_cast %57 : vector<1x128xf32> to vector<128xf32>
      %59 = vector.shape_cast %58 : vector<128xf32> to vector<1x128xf32>
      %60 = vector.broadcast %59 : vector<1x128xf32> to vector<8x128xf32>
      %61 = arith.subf %7, %60 : vector<8x128xf32>
      %c10 = arith.constant 10 : index
      %c0_22 = arith.constant 0 : index
      %62 = vector.load %arg3[%c10, %c0_22] : memref<16x128xf32, #tpu.memory_space<vmem>>, vector<1x128xf32>
      %63 = vector.shape_cast %62 : vector<1x128xf32> to vector<128xf32>
      %64 = vector.shape_cast %63 : vector<128xf32> to vector<1x128xf32>
      %65 = vector.broadcast %64 : vector<1x128xf32> to vector<8x128xf32>
      %66 = arith.subf %7, %65 : vector<8x128xf32>
      %c11 = arith.constant 11 : index
      %c0_23 = arith.constant 0 : index
      %67 = vector.load %arg3[%c11, %c0_23] : memref<16x128xf32, #tpu.memory_space<vmem>>, vector<1x128xf32>
      %68 = vector.shape_cast %67 : vector<1x128xf32> to vector<128xf32>
      %69 = vector.shape_cast %68 : vector<128xf32> to vector<1x128xf32>
      %70 = vector.broadcast %69 : vector<1x128xf32> to vector<8x128xf32>
      %71 = arith.subf %7, %70 : vector<8x128xf32>
      %c12 = arith.constant 12 : index
      %c0_24 = arith.constant 0 : index
      %72 = vector.load %arg3[%c12, %c0_24] : memref<16x128xf32, #tpu.memory_space<vmem>>, vector<1x128xf32>
      %73 = vector.shape_cast %72 : vector<1x128xf32> to vector<128xf32>
      %74 = vector.shape_cast %73 : vector<128xf32> to vector<1x128xf32>
      %75 = vector.broadcast %74 : vector<1x128xf32> to vector<8x128xf32>
      %76 = arith.subf %7, %75 : vector<8x128xf32>
      %c13 = arith.constant 13 : index
      %c0_25 = arith.constant 0 : index
      %77 = vector.load %arg3[%c13, %c0_25] : memref<16x128xf32, #tpu.memory_space<vmem>>, vector<1x128xf32>
      %78 = vector.shape_cast %77 : vector<1x128xf32> to vector<128xf32>
      %79 = vector.shape_cast %78 : vector<128xf32> to vector<1x128xf32>
      %80 = vector.broadcast %79 : vector<1x128xf32> to vector<8x128xf32>
      %81 = arith.subf %7, %80 : vector<8x128xf32>
      %c14 = arith.constant 14 : index
      %c0_26 = arith.constant 0 : index
      %82 = vector.load %arg3[%c14, %c0_26] : memref<16x128xf32, #tpu.memory_space<vmem>>, vector<1x128xf32>
      %83 = vector.shape_cast %82 : vector<1x128xf32> to vector<128xf32>
      %84 = vector.shape_cast %83 : vector<128xf32> to vector<1x128xf32>
      %85 = vector.broadcast %84 : vector<1x128xf32> to vector<8x128xf32>
      %86 = arith.subf %7, %85 : vector<8x128xf32>
      %c15 = arith.constant 15 : index
      %c0_27 = arith.constant 0 : index
      %87 = vector.load %arg3[%c15, %c0_27] : memref<16x128xf32, #tpu.memory_space<vmem>>, vector<1x128xf32>
      %88 = vector.shape_cast %87 : vector<1x128xf32> to vector<128xf32>
      %89 = vector.shape_cast %88 : vector<128xf32> to vector<1x128xf32>
      %90 = vector.broadcast %89 : vector<1x128xf32> to vector<8x128xf32>
      %91 = arith.subf %7, %90 : vector<8x128xf32>
      %cst_28 = arith.constant 0.000000e+00 : f32
      %92 = vector.broadcast %cst_28 : f32 to vector<8x128xf32>
      %93 = arith.cmpf oge, %16, %92 : vector<8x128xf32>
      %cst_29 = arith.constant 0.000000e+00 : f32
      %94 = vector.broadcast %cst_29 : f32 to vector<8x128xf32>
      %95 = arith.cmpf olt, %21, %94 : vector<8x128xf32>
      %96 = arith.andi %93, %95 : vector<8x128xi1>
      %97 = arith.extui %96 : vector<8x128xi1> to vector<8x128xi32>
      %98 = arith.sitofp %97 : vector<8x128xi32> to vector<8x128xf32>
      %cst_30 = arith.constant 0.000000e+00 : f32
      %99 = vector.broadcast %cst_30 : f32 to vector<8x128xf32>
      %100 = arith.cmpf oge, %21, %99 : vector<8x128xf32>
      %cst_31 = arith.constant 0.000000e+00 : f32
      %101 = vector.broadcast %cst_31 : f32 to vector<8x128xf32>
      %102 = arith.cmpf olt, %26, %101 : vector<8x128xf32>
      %103 = arith.andi %100, %102 : vector<8x128xi1>
      %104 = arith.extui %103 : vector<8x128xi1> to vector<8x128xi32>
      %105 = arith.sitofp %104 : vector<8x128xi32> to vector<8x128xf32>
      %cst_32 = arith.constant 0.000000e+00 : f32
      %106 = vector.broadcast %cst_32 : f32 to vector<8x128xf32>
      %107 = arith.cmpf oge, %26, %106 : vector<8x128xf32>
      %cst_33 = arith.constant 0.000000e+00 : f32
      %108 = vector.broadcast %cst_33 : f32 to vector<8x128xf32>
      %109 = arith.cmpf olt, %31, %108 : vector<8x128xf32>
      %110 = arith.andi %107, %109 : vector<8x128xi1>
      %111 = arith.extui %110 : vector<8x128xi1> to vector<8x128xi32>
      %112 = arith.sitofp %111 : vector<8x128xi32> to vector<8x128xf32>
      %cst_34 = arith.constant 0.000000e+00 : f32
      %113 = vector.broadcast %cst_34 : f32 to vector<8x128xf32>
      %114 = arith.cmpf oge, %31, %113 : vector<8x128xf32>
      %cst_35 = arith.constant 0.000000e+00 : f32
      %115 = vector.broadcast %cst_35 : f32 to vector<8x128xf32>
      %116 = arith.cmpf olt, %36, %115 : vector<8x128xf32>
      %117 = arith.andi %114, %116 : vector<8x128xi1>
      %118 = arith.extui %117 : vector<8x128xi1> to vector<8x128xi32>
      %119 = arith.sitofp %118 : vector<8x128xi32> to vector<8x128xf32>
      %cst_36 = arith.constant 0.000000e+00 : f32
      %120 = vector.broadcast %cst_36 : f32 to vector<8x128xf32>
      %121 = arith.cmpf oge, %36, %120 : vector<8x128xf32>
      %cst_37 = arith.constant 0.000000e+00 : f32
      %122 = vector.broadcast %cst_37 : f32 to vector<8x128xf32>
      %123 = arith.cmpf olt, %41, %122 : vector<8x128xf32>
      %124 = arith.andi %121, %123 : vector<8x128xi1>
      %125 = arith.extui %124 : vector<8x128xi1> to vector<8x128xi32>
      %126 = arith.sitofp %125 : vector<8x128xi32> to vector<8x128xf32>
      %cst_38 = arith.constant 0.000000e+00 : f32
      %127 = vector.broadcast %cst_38 : f32 to vector<8x128xf32>
      %128 = arith.cmpf oge, %41, %127 : vector<8x128xf32>
      %cst_39 = arith.constant 0.000000e+00 : f32
      %129 = vector.broadcast %cst_39 : f32 to vector<8x128xf32>
      %130 = arith.cmpf olt, %46, %129 : vector<8x128xf32>
      %131 = arith.andi %128, %130 : vector<8x128xi1>
      %132 = arith.extui %131 : vector<8x128xi1> to vector<8x128xi32>
      %133 = arith.sitofp %132 : vector<8x128xi32> to vector<8x128xf32>
      %cst_40 = arith.constant 0.000000e+00 : f32
      %134 = vector.broadcast %cst_40 : f32 to vector<8x128xf32>
      %135 = arith.cmpf oge, %46, %134 : vector<8x128xf32>
      %cst_41 = arith.constant 0.000000e+00 : f32
      %136 = vector.broadcast %cst_41 : f32 to vector<8x128xf32>
      %137 = arith.cmpf olt, %51, %136 : vector<8x128xf32>
      %138 = arith.andi %135, %137 : vector<8x128xi1>
      %139 = arith.extui %138 : vector<8x128xi1> to vector<8x128xi32>
      %140 = arith.sitofp %139 : vector<8x128xi32> to vector<8x128xf32>
      %cst_42 = arith.constant 0.000000e+00 : f32
      %141 = vector.broadcast %cst_42 : f32 to vector<8x128xf32>
      %142 = arith.cmpf oge, %51, %141 : vector<8x128xf32>
      %cst_43 = arith.constant 0.000000e+00 : f32
      %143 = vector.broadcast %cst_43 : f32 to vector<8x128xf32>
      %144 = arith.cmpf olt, %56, %143 : vector<8x128xf32>
      %145 = arith.andi %142, %144 : vector<8x128xi1>
      %146 = arith.extui %145 : vector<8x128xi1> to vector<8x128xi32>
      %147 = arith.sitofp %146 : vector<8x128xi32> to vector<8x128xf32>
      %cst_44 = arith.constant 0.000000e+00 : f32
      %148 = vector.broadcast %cst_44 : f32 to vector<8x128xf32>
      %149 = arith.cmpf oge, %56, %148 : vector<8x128xf32>
      %cst_45 = arith.constant 0.000000e+00 : f32
      %150 = vector.broadcast %cst_45 : f32 to vector<8x128xf32>
      %151 = arith.cmpf olt, %61, %150 : vector<8x128xf32>
      %152 = arith.andi %149, %151 : vector<8x128xi1>
      %153 = arith.extui %152 : vector<8x128xi1> to vector<8x128xi32>
      %154 = arith.sitofp %153 : vector<8x128xi32> to vector<8x128xf32>
      %cst_46 = arith.constant 0.000000e+00 : f32
      %155 = vector.broadcast %cst_46 : f32 to vector<8x128xf32>
      %156 = arith.cmpf oge, %61, %155 : vector<8x128xf32>
      %cst_47 = arith.constant 0.000000e+00 : f32
      %157 = vector.broadcast %cst_47 : f32 to vector<8x128xf32>
      %158 = arith.cmpf olt, %66, %157 : vector<8x128xf32>
      %159 = arith.andi %156, %158 : vector<8x128xi1>
      %160 = arith.extui %159 : vector<8x128xi1> to vector<8x128xi32>
      %161 = arith.sitofp %160 : vector<8x128xi32> to vector<8x128xf32>
      %cst_48 = arith.constant 0.000000e+00 : f32
      %162 = vector.broadcast %cst_48 : f32 to vector<8x128xf32>
      %163 = arith.cmpf oge, %66, %162 : vector<8x128xf32>
      %cst_49 = arith.constant 0.000000e+00 : f32
      %164 = vector.broadcast %cst_49 : f32 to vector<8x128xf32>
      %165 = arith.cmpf olt, %71, %164 : vector<8x128xf32>
      %166 = arith.andi %163, %165 : vector<8x128xi1>
      %167 = arith.extui %166 : vector<8x128xi1> to vector<8x128xi32>
      %168 = arith.sitofp %167 : vector<8x128xi32> to vector<8x128xf32>
      %cst_50 = arith.constant 0.000000e+00 : f32
      %169 = vector.broadcast %cst_50 : f32 to vector<8x128xf32>
      %170 = arith.cmpf oge, %71, %169 : vector<8x128xf32>
      %cst_51 = arith.constant 0.000000e+00 : f32
      %171 = vector.broadcast %cst_51 : f32 to vector<8x128xf32>
      %172 = arith.cmpf olt, %76, %171 : vector<8x128xf32>
      %173 = arith.andi %170, %172 : vector<8x128xi1>
      %174 = arith.extui %173 : vector<8x128xi1> to vector<8x128xi32>
      %175 = arith.sitofp %174 : vector<8x128xi32> to vector<8x128xf32>
      %cst_52 = arith.constant 0.000000e+00 : f32
      %176 = vector.broadcast %cst_52 : f32 to vector<8x128xf32>
      %177 = arith.cmpf oge, %76, %176 : vector<8x128xf32>
      %cst_53 = arith.constant 0.000000e+00 : f32
      %178 = vector.broadcast %cst_53 : f32 to vector<8x128xf32>
      %179 = arith.cmpf olt, %81, %178 : vector<8x128xf32>
      %180 = arith.andi %177, %179 : vector<8x128xi1>
      %181 = arith.extui %180 : vector<8x128xi1> to vector<8x128xi32>
      %182 = arith.sitofp %181 : vector<8x128xi32> to vector<8x128xf32>
      %cst_54 = arith.constant 0.000000e+00 : f32
      %183 = vector.broadcast %cst_54 : f32 to vector<8x128xf32>
      %184 = arith.cmpf oge, %81, %183 : vector<8x128xf32>
      %cst_55 = arith.constant 0.000000e+00 : f32
      %185 = vector.broadcast %cst_55 : f32 to vector<8x128xf32>
      %186 = arith.cmpf olt, %86, %185 : vector<8x128xf32>
      %187 = arith.andi %184, %186 : vector<8x128xi1>
      %188 = arith.extui %187 : vector<8x128xi1> to vector<8x128xi32>
      %189 = arith.sitofp %188 : vector<8x128xi32> to vector<8x128xf32>
      %cst_56 = arith.constant 0.000000e+00 : f32
      %190 = vector.broadcast %cst_56 : f32 to vector<8x128xf32>
      %191 = arith.cmpf oge, %86, %190 : vector<8x128xf32>
      %cst_57 = arith.constant 0.000000e+00 : f32
      %192 = vector.broadcast %cst_57 : f32 to vector<8x128xf32>
      %193 = arith.cmpf olt, %91, %192 : vector<8x128xf32>
      %194 = arith.andi %191, %193 : vector<8x128xi1>
      %195 = arith.extui %194 : vector<8x128xi1> to vector<8x128xi32>
      %196 = arith.sitofp %195 : vector<8x128xi32> to vector<8x128xf32>
      %c0_58 = arith.constant 0 : index
      %c0_59 = arith.constant 0 : index
      %197 = vector.load %arg4[%c0_58, %c0_59] : memref<65x128xf32, #tpu.memory_space<vmem>>, vector<1x128xf32>
      %198 = vector.shape_cast %197 : vector<1x128xf32> to vector<128xf32>
      %199 = vector.shape_cast %198 : vector<128xf32> to vector<1x128xf32>
      %200 = vector.broadcast %199 : vector<1x128xf32> to vector<8x128xf32>
      %201 = arith.mulf %16, %200 : vector<8x128xf32>
      %c1_60 = arith.constant 1 : index
      %c0_61 = arith.constant 0 : index
      %202 = vector.load %arg4[%c1_60, %c0_61] : memref<65x128xf32, #tpu.memory_space<vmem>>, vector<1x128xf32>
      %203 = vector.shape_cast %202 : vector<1x128xf32> to vector<128xf32>
      %204 = vector.shape_cast %203 : vector<128xf32> to vector<1x128xf32>
      %205 = vector.broadcast %204 : vector<1x128xf32> to vector<8x128xf32>
      %206 = arith.mulf %21, %205 : vector<8x128xf32>
      %c2_62 = arith.constant 2 : index
      %c0_63 = arith.constant 0 : index
      %207 = vector.load %arg4[%c2_62, %c0_63] : memref<65x128xf32, #tpu.memory_space<vmem>>, vector<1x128xf32>
      %208 = vector.shape_cast %207 : vector<1x128xf32> to vector<128xf32>
      %209 = vector.shape_cast %208 : vector<128xf32> to vector<1x128xf32>
      %210 = vector.broadcast %209 : vector<1x128xf32> to vector<8x128xf32>
      %211 = arith.mulf %26, %210 : vector<8x128xf32>
      %c3_64 = arith.constant 3 : index
      %c0_65 = arith.constant 0 : index
      %212 = vector.load %arg4[%c3_64, %c0_65] : memref<65x128xf32, #tpu.memory_space<vmem>>, vector<1x128xf32>
      %213 = vector.shape_cast %212 : vector<1x128xf32> to vector<128xf32>
      %214 = vector.shape_cast %213 : vector<128xf32> to vector<1x128xf32>
      %215 = vector.broadcast %214 : vector<1x128xf32> to vector<8x128xf32>
      %216 = arith.mulf %31, %215 : vector<8x128xf32>
      %c4_66 = arith.constant 4 : index
      %c0_67 = arith.constant 0 : index
      %217 = vector.load %arg4[%c4_66, %c0_67] : memref<65x128xf32, #tpu.memory_space<vmem>>, vector<1x128xf32>
      %218 = vector.shape_cast %217 : vector<1x128xf32> to vector<128xf32>
      %219 = vector.shape_cast %218 : vector<128xf32> to vector<1x128xf32>
      %220 = vector.broadcast %219 : vector<1x128xf32> to vector<8x128xf32>
      %221 = arith.mulf %36, %220 : vector<8x128xf32>
      %c5_68 = arith.constant 5 : index
      %c0_69 = arith.constant 0 : index
      %222 = vector.load %arg4[%c5_68, %c0_69] : memref<65x128xf32, #tpu.memory_space<vmem>>, vector<1x128xf32>
      %223 = vector.shape_cast %222 : vector<1x128xf32> to vector<128xf32>
      %224 = vector.shape_cast %223 : vector<128xf32> to vector<1x128xf32>
      %225 = vector.broadcast %224 : vector<1x128xf32> to vector<8x128xf32>
      %226 = arith.mulf %41, %225 : vector<8x128xf32>
      %c6_70 = arith.constant 6 : index
      %c0_71 = arith.constant 0 : index
      %227 = vector.load %arg4[%c6_70, %c0_71] : memref<65x128xf32, #tpu.memory_space<vmem>>, vector<1x128xf32>
      %228 = vector.shape_cast %227 : vector<1x128xf32> to vector<128xf32>
      %229 = vector.shape_cast %228 : vector<128xf32> to vector<1x128xf32>
      %230 = vector.broadcast %229 : vector<1x128xf32> to vector<8x128xf32>
      %231 = arith.mulf %46, %230 : vector<8x128xf32>
      %c7_72 = arith.constant 7 : index
      %c0_73 = arith.constant 0 : index
      %232 = vector.load %arg4[%c7_72, %c0_73] : memref<65x128xf32, #tpu.memory_space<vmem>>, vector<1x128xf32>
      %233 = vector.shape_cast %232 : vector<1x128xf32> to vector<128xf32>
      %234 = vector.shape_cast %233 : vector<128xf32> to vector<1x128xf32>
      %235 = vector.broadcast %234 : vector<1x128xf32> to vector<8x128xf32>
      %236 = arith.mulf %51, %235 : vector<8x128xf32>
      %c8_74 = arith.constant 8 : index
      %c0_75 = arith.constant 0 : index
      %237 = vector.load %arg4[%c8_74, %c0_75] : memref<65x128xf32, #tpu.memory_space<vmem>>, vector<1x128xf32>
      %238 = vector.shape_cast %237 : vector<1x128xf32> to vector<128xf32>
      %239 = vector.shape_cast %238 : vector<128xf32> to vector<1x128xf32>
      %240 = vector.broadcast %239 : vector<1x128xf32> to vector<8x128xf32>
      %241 = arith.mulf %56, %240 : vector<8x128xf32>
      %c9_76 = arith.constant 9 : index
      %c0_77 = arith.constant 0 : index
      %242 = vector.load %arg4[%c9_76, %c0_77] : memref<65x128xf32, #tpu.memory_space<vmem>>, vector<1x128xf32>
      %243 = vector.shape_cast %242 : vector<1x128xf32> to vector<128xf32>
      %244 = vector.shape_cast %243 : vector<128xf32> to vector<1x128xf32>
      %245 = vector.broadcast %244 : vector<1x128xf32> to vector<8x128xf32>
      %246 = arith.mulf %61, %245 : vector<8x128xf32>
      %c10_78 = arith.constant 10 : index
      %c0_79 = arith.constant 0 : index
      %247 = vector.load %arg4[%c10_78, %c0_79] : memref<65x128xf32, #tpu.memory_space<vmem>>, vector<1x128xf32>
      %248 = vector.shape_cast %247 : vector<1x128xf32> to vector<128xf32>
      %249 = vector.shape_cast %248 : vector<128xf32> to vector<1x128xf32>
      %250 = vector.broadcast %249 : vector<1x128xf32> to vector<8x128xf32>
      %251 = arith.mulf %66, %250 : vector<8x128xf32>
      %c11_80 = arith.constant 11 : index
      %c0_81 = arith.constant 0 : index
      %252 = vector.load %arg4[%c11_80, %c0_81] : memref<65x128xf32, #tpu.memory_space<vmem>>, vector<1x128xf32>
      %253 = vector.shape_cast %252 : vector<1x128xf32> to vector<128xf32>
      %254 = vector.shape_cast %253 : vector<128xf32> to vector<1x128xf32>
      %255 = vector.broadcast %254 : vector<1x128xf32> to vector<8x128xf32>
      %256 = arith.mulf %71, %255 : vector<8x128xf32>
      %c12_82 = arith.constant 12 : index
      %c0_83 = arith.constant 0 : index
      %257 = vector.load %arg4[%c12_82, %c0_83] : memref<65x128xf32, #tpu.memory_space<vmem>>, vector<1x128xf32>
      %258 = vector.shape_cast %257 : vector<1x128xf32> to vector<128xf32>
      %259 = vector.shape_cast %258 : vector<128xf32> to vector<1x128xf32>
      %260 = vector.broadcast %259 : vector<1x128xf32> to vector<8x128xf32>
      %261 = arith.mulf %76, %260 : vector<8x128xf32>
      %c13_84 = arith.constant 13 : index
      %c0_85 = arith.constant 0 : index
      %262 = vector.load %arg4[%c13_84, %c0_85] : memref<65x128xf32, #tpu.memory_space<vmem>>, vector<1x128xf32>
      %263 = vector.shape_cast %262 : vector<1x128xf32> to vector<128xf32>
      %264 = vector.shape_cast %263 : vector<128xf32> to vector<1x128xf32>
      %265 = vector.broadcast %264 : vector<1x128xf32> to vector<8x128xf32>
      %266 = arith.mulf %81, %265 : vector<8x128xf32>
      %c14_86 = arith.constant 14 : index
      %c0_87 = arith.constant 0 : index
      %267 = vector.load %arg4[%c14_86, %c0_87] : memref<65x128xf32, #tpu.memory_space<vmem>>, vector<1x128xf32>
      %268 = vector.shape_cast %267 : vector<1x128xf32> to vector<128xf32>
      %269 = vector.shape_cast %268 : vector<128xf32> to vector<1x128xf32>
      %270 = vector.broadcast %269 : vector<1x128xf32> to vector<8x128xf32>
      %271 = arith.mulf %86, %270 : vector<8x128xf32>
      %272 = arith.mulf %201, %98 : vector<8x128xf32>
      %cst_88 = arith.constant 1.000000e+00 : f32
      %273 = vector.broadcast %cst_88 : f32 to vector<8x128xf32>
      %274 = arith.subf %273, %206 : vector<8x128xf32>
      %275 = arith.mulf %274, %105 : vector<8x128xf32>
      %276 = arith.addf %272, %275 : vector<8x128xf32>
      %277 = arith.mulf %206, %105 : vector<8x128xf32>
      %cst_89 = arith.constant 1.000000e+00 : f32
      %278 = vector.broadcast %cst_89 : f32 to vector<8x128xf32>
      %279 = arith.subf %278, %211 : vector<8x128xf32>
      %280 = arith.mulf %279, %112 : vector<8x128xf32>
      %281 = arith.addf %277, %280 : vector<8x128xf32>
      %282 = arith.mulf %211, %112 : vector<8x128xf32>
      %cst_90 = arith.constant 1.000000e+00 : f32
      %283 = vector.broadcast %cst_90 : f32 to vector<8x128xf32>
      %284 = arith.subf %283, %216 : vector<8x128xf32>
      %285 = arith.mulf %284, %119 : vector<8x128xf32>
      %286 = arith.addf %282, %285 : vector<8x128xf32>
      %287 = arith.mulf %216, %119 : vector<8x128xf32>
      %cst_91 = arith.constant 1.000000e+00 : f32
      %288 = vector.broadcast %cst_91 : f32 to vector<8x128xf32>
      %289 = arith.subf %288, %221 : vector<8x128xf32>
      %290 = arith.mulf %289, %126 : vector<8x128xf32>
      %291 = arith.addf %287, %290 : vector<8x128xf32>
      %292 = arith.mulf %221, %126 : vector<8x128xf32>
      %cst_92 = arith.constant 1.000000e+00 : f32
      %293 = vector.broadcast %cst_92 : f32 to vector<8x128xf32>
      %294 = arith.subf %293, %226 : vector<8x128xf32>
      %295 = arith.mulf %294, %133 : vector<8x128xf32>
      %296 = arith.addf %292, %295 : vector<8x128xf32>
      %297 = arith.mulf %226, %133 : vector<8x128xf32>
      %cst_93 = arith.constant 1.000000e+00 : f32
      %298 = vector.broadcast %cst_93 : f32 to vector<8x128xf32>
      %299 = arith.subf %298, %231 : vector<8x128xf32>
      %300 = arith.mulf %299, %140 : vector<8x128xf32>
      %301 = arith.addf %297, %300 : vector<8x128xf32>
      %302 = arith.mulf %231, %140 : vector<8x128xf32>
      %cst_94 = arith.constant 1.000000e+00 : f32
      %303 = vector.broadcast %cst_94 : f32 to vector<8x128xf32>
      %304 = arith.subf %303, %236 : vector<8x128xf32>
      %305 = arith.mulf %304, %147 : vector<8x128xf32>
      %306 = arith.addf %302, %305 : vector<8x128xf32>
      %307 = arith.mulf %236, %147 : vector<8x128xf32>
      %cst_95 = arith.constant 1.000000e+00 : f32
      %308 = vector.broadcast %cst_95 : f32 to vector<8x128xf32>
      %309 = arith.subf %308, %241 : vector<8x128xf32>
      %310 = arith.mulf %309, %154 : vector<8x128xf32>
      %311 = arith.addf %307, %310 : vector<8x128xf32>
      %312 = arith.mulf %241, %154 : vector<8x128xf32>
      %cst_96 = arith.constant 1.000000e+00 : f32
      %313 = vector.broadcast %cst_96 : f32 to vector<8x128xf32>
      %314 = arith.subf %313, %246 : vector<8x128xf32>
      %315 = arith.mulf %314, %161 : vector<8x128xf32>
      %316 = arith.addf %312, %315 : vector<8x128xf32>
      %317 = arith.mulf %246, %161 : vector<8x128xf32>
      %cst_97 = arith.constant 1.000000e+00 : f32
      %318 = vector.broadcast %cst_97 : f32 to vector<8x128xf32>
      %319 = arith.subf %318, %251 : vector<8x128xf32>
      %320 = arith.mulf %319, %168 : vector<8x128xf32>
      %321 = arith.addf %317, %320 : vector<8x128xf32>
      %322 = arith.mulf %251, %168 : vector<8x128xf32>
      %cst_98 = arith.constant 1.000000e+00 : f32
      %323 = vector.broadcast %cst_98 : f32 to vector<8x128xf32>
      %324 = arith.subf %323, %256 : vector<8x128xf32>
      %325 = arith.mulf %324, %175 : vector<8x128xf32>
      %326 = arith.addf %322, %325 : vector<8x128xf32>
      %327 = arith.mulf %256, %175 : vector<8x128xf32>
      %cst_99 = arith.constant 1.000000e+00 : f32
      %328 = vector.broadcast %cst_99 : f32 to vector<8x128xf32>
      %329 = arith.subf %328, %261 : vector<8x128xf32>
      %330 = arith.mulf %329, %182 : vector<8x128xf32>
      %331 = arith.addf %327, %330 : vector<8x128xf32>
      %332 = arith.mulf %261, %182 : vector<8x128xf32>
      %cst_100 = arith.constant 1.000000e+00 : f32
      %333 = vector.broadcast %cst_100 : f32 to vector<8x128xf32>
      %334 = arith.subf %333, %266 : vector<8x128xf32>
      %335 = arith.mulf %334, %189 : vector<8x128xf32>
      %336 = arith.addf %332, %335 : vector<8x128xf32>
      %337 = arith.mulf %266, %189 : vector<8x128xf32>
      %cst_101 = arith.constant 1.000000e+00 : f32
      %338 = vector.broadcast %cst_101 : f32 to vector<8x128xf32>
      %339 = arith.subf %338, %271 : vector<8x128xf32>
      %340 = arith.mulf %339, %196 : vector<8x128xf32>
      %341 = arith.addf %337, %340 : vector<8x128xf32>
      %c15_102 = arith.constant 15 : index
      %c0_103 = arith.constant 0 : index
      %342 = vector.load %arg4[%c15_102, %c0_103] : memref<65x128xf32, #tpu.memory_space<vmem>>, vector<1x128xf32>
      %343 = vector.shape_cast %342 : vector<1x128xf32> to vector<128xf32>
      %344 = vector.shape_cast %343 : vector<128xf32> to vector<1x128xf32>
      %345 = vector.broadcast %344 : vector<1x128xf32> to vector<8x128xf32>
      %346 = arith.mulf %16, %345 : vector<8x128xf32>
      %c16 = arith.constant 16 : index
      %c0_104 = arith.constant 0 : index
      %347 = vector.load %arg4[%c16, %c0_104] : memref<65x128xf32, #tpu.memory_space<vmem>>, vector<1x128xf32>
      %348 = vector.shape_cast %347 : vector<1x128xf32> to vector<128xf32>
      %349 = vector.shape_cast %348 : vector<128xf32> to vector<1x128xf32>
      %350 = vector.broadcast %349 : vector<1x128xf32> to vector<8x128xf32>
      %351 = arith.mulf %21, %350 : vector<8x128xf32>
      %c17 = arith.constant 17 : index
      %c0_105 = arith.constant 0 : index
      %352 = vector.load %arg4[%c17, %c0_105] : memref<65x128xf32, #tpu.memory_space<vmem>>, vector<1x128xf32>
      %353 = vector.shape_cast %352 : vector<1x128xf32> to vector<128xf32>
      %354 = vector.shape_cast %353 : vector<128xf32> to vector<1x128xf32>
      %355 = vector.broadcast %354 : vector<1x128xf32> to vector<8x128xf32>
      %356 = arith.mulf %26, %355 : vector<8x128xf32>
      %c18 = arith.constant 18 : index
      %c0_106 = arith.constant 0 : index
      %357 = vector.load %arg4[%c18, %c0_106] : memref<65x128xf32, #tpu.memory_space<vmem>>, vector<1x128xf32>
      %358 = vector.shape_cast %357 : vector<1x128xf32> to vector<128xf32>
      %359 = vector.shape_cast %358 : vector<128xf32> to vector<1x128xf32>
      %360 = vector.broadcast %359 : vector<1x128xf32> to vector<8x128xf32>
      %361 = arith.mulf %31, %360 : vector<8x128xf32>
      %c19 = arith.constant 19 : index
      %c0_107 = arith.constant 0 : index
      %362 = vector.load %arg4[%c19, %c0_107] : memref<65x128xf32, #tpu.memory_space<vmem>>, vector<1x128xf32>
      %363 = vector.shape_cast %362 : vector<1x128xf32> to vector<128xf32>
      %364 = vector.shape_cast %363 : vector<128xf32> to vector<1x128xf32>
      %365 = vector.broadcast %364 : vector<1x128xf32> to vector<8x128xf32>
      %366 = arith.mulf %36, %365 : vector<8x128xf32>
      %c20 = arith.constant 20 : index
      %c0_108 = arith.constant 0 : index
      %367 = vector.load %arg4[%c20, %c0_108] : memref<65x128xf32, #tpu.memory_space<vmem>>, vector<1x128xf32>
      %368 = vector.shape_cast %367 : vector<1x128xf32> to vector<128xf32>
      %369 = vector.shape_cast %368 : vector<128xf32> to vector<1x128xf32>
      %370 = vector.broadcast %369 : vector<1x128xf32> to vector<8x128xf32>
      %371 = arith.mulf %41, %370 : vector<8x128xf32>
      %c21 = arith.constant 21 : index
      %c0_109 = arith.constant 0 : index
      %372 = vector.load %arg4[%c21, %c0_109] : memref<65x128xf32, #tpu.memory_space<vmem>>, vector<1x128xf32>
      %373 = vector.shape_cast %372 : vector<1x128xf32> to vector<128xf32>
      %374 = vector.shape_cast %373 : vector<128xf32> to vector<1x128xf32>
      %375 = vector.broadcast %374 : vector<1x128xf32> to vector<8x128xf32>
      %376 = arith.mulf %46, %375 : vector<8x128xf32>
      %c22 = arith.constant 22 : index
      %c0_110 = arith.constant 0 : index
      %377 = vector.load %arg4[%c22, %c0_110] : memref<65x128xf32, #tpu.memory_space<vmem>>, vector<1x128xf32>
      %378 = vector.shape_cast %377 : vector<1x128xf32> to vector<128xf32>
      %379 = vector.shape_cast %378 : vector<128xf32> to vector<1x128xf32>
      %380 = vector.broadcast %379 : vector<1x128xf32> to vector<8x128xf32>
      %381 = arith.mulf %51, %380 : vector<8x128xf32>
      %c23 = arith.constant 23 : index
      %c0_111 = arith.constant 0 : index
      %382 = vector.load %arg4[%c23, %c0_111] : memref<65x128xf32, #tpu.memory_space<vmem>>, vector<1x128xf32>
      %383 = vector.shape_cast %382 : vector<1x128xf32> to vector<128xf32>
      %384 = vector.shape_cast %383 : vector<128xf32> to vector<1x128xf32>
      %385 = vector.broadcast %384 : vector<1x128xf32> to vector<8x128xf32>
      %386 = arith.mulf %56, %385 : vector<8x128xf32>
      %c24 = arith.constant 24 : index
      %c0_112 = arith.constant 0 : index
      %387 = vector.load %arg4[%c24, %c0_112] : memref<65x128xf32, #tpu.memory_space<vmem>>, vector<1x128xf32>
      %388 = vector.shape_cast %387 : vector<1x128xf32> to vector<128xf32>
      %389 = vector.shape_cast %388 : vector<128xf32> to vector<1x128xf32>
      %390 = vector.broadcast %389 : vector<1x128xf32> to vector<8x128xf32>
      %391 = arith.mulf %61, %390 : vector<8x128xf32>
      %c25 = arith.constant 25 : index
      %c0_113 = arith.constant 0 : index
      %392 = vector.load %arg4[%c25, %c0_113] : memref<65x128xf32, #tpu.memory_space<vmem>>, vector<1x128xf32>
      %393 = vector.shape_cast %392 : vector<1x128xf32> to vector<128xf32>
      %394 = vector.shape_cast %393 : vector<128xf32> to vector<1x128xf32>
      %395 = vector.broadcast %394 : vector<1x128xf32> to vector<8x128xf32>
      %396 = arith.mulf %66, %395 : vector<8x128xf32>
      %c26 = arith.constant 26 : index
      %c0_114 = arith.constant 0 : index
      %397 = vector.load %arg4[%c26, %c0_114] : memref<65x128xf32, #tpu.memory_space<vmem>>, vector<1x128xf32>
      %398 = vector.shape_cast %397 : vector<1x128xf32> to vector<128xf32>
      %399 = vector.shape_cast %398 : vector<128xf32> to vector<1x128xf32>
      %400 = vector.broadcast %399 : vector<1x128xf32> to vector<8x128xf32>
      %401 = arith.mulf %71, %400 : vector<8x128xf32>
      %c27 = arith.constant 27 : index
      %c0_115 = arith.constant 0 : index
      %402 = vector.load %arg4[%c27, %c0_115] : memref<65x128xf32, #tpu.memory_space<vmem>>, vector<1x128xf32>
      %403 = vector.shape_cast %402 : vector<1x128xf32> to vector<128xf32>
      %404 = vector.shape_cast %403 : vector<128xf32> to vector<1x128xf32>
      %405 = vector.broadcast %404 : vector<1x128xf32> to vector<8x128xf32>
      %406 = arith.mulf %76, %405 : vector<8x128xf32>
      %c28 = arith.constant 28 : index
      %c0_116 = arith.constant 0 : index
      %407 = vector.load %arg4[%c28, %c0_116] : memref<65x128xf32, #tpu.memory_space<vmem>>, vector<1x128xf32>
      %408 = vector.shape_cast %407 : vector<1x128xf32> to vector<128xf32>
      %409 = vector.shape_cast %408 : vector<128xf32> to vector<1x128xf32>
      %410 = vector.broadcast %409 : vector<1x128xf32> to vector<8x128xf32>
      %411 = arith.mulf %81, %410 : vector<8x128xf32>
      %412 = arith.mulf %346, %276 : vector<8x128xf32>
      %cst_117 = arith.constant 1.000000e+00 : f32
      %413 = vector.broadcast %cst_117 : f32 to vector<8x128xf32>
      %414 = arith.subf %413, %351 : vector<8x128xf32>
      %415 = arith.mulf %414, %281 : vector<8x128xf32>
      %416 = arith.addf %412, %415 : vector<8x128xf32>
      %417 = arith.mulf %351, %281 : vector<8x128xf32>
      %cst_118 = arith.constant 1.000000e+00 : f32
      %418 = vector.broadcast %cst_118 : f32 to vector<8x128xf32>
      %419 = arith.subf %418, %356 : vector<8x128xf32>
      %420 = arith.mulf %419, %286 : vector<8x128xf32>
      %421 = arith.addf %417, %420 : vector<8x128xf32>
      %422 = arith.mulf %356, %286 : vector<8x128xf32>
      %cst_119 = arith.constant 1.000000e+00 : f32
      %423 = vector.broadcast %cst_119 : f32 to vector<8x128xf32>
      %424 = arith.subf %423, %361 : vector<8x128xf32>
      %425 = arith.mulf %424, %291 : vector<8x128xf32>
      %426 = arith.addf %422, %425 : vector<8x128xf32>
      %427 = arith.mulf %361, %291 : vector<8x128xf32>
      %cst_120 = arith.constant 1.000000e+00 : f32
      %428 = vector.broadcast %cst_120 : f32 to vector<8x128xf32>
      %429 = arith.subf %428, %366 : vector<8x128xf32>
      %430 = arith.mulf %429, %296 : vector<8x128xf32>
      %431 = arith.addf %427, %430 : vector<8x128xf32>
      %432 = arith.mulf %366, %296 : vector<8x128xf32>
      %cst_121 = arith.constant 1.000000e+00 : f32
      %433 = vector.broadcast %cst_121 : f32 to vector<8x128xf32>
      %434 = arith.subf %433, %371 : vector<8x128xf32>
      %435 = arith.mulf %434, %301 : vector<8x128xf32>
      %436 = arith.addf %432, %435 : vector<8x128xf32>
      %437 = arith.mulf %371, %301 : vector<8x128xf32>
      %cst_122 = arith.constant 1.000000e+00 : f32
      %438 = vector.broadcast %cst_122 : f32 to vector<8x128xf32>
      %439 = arith.subf %438, %376 : vector<8x128xf32>
      %440 = arith.mulf %439, %306 : vector<8x128xf32>
      %441 = arith.addf %437, %440 : vector<8x128xf32>
      %442 = arith.mulf %376, %306 : vector<8x128xf32>
      %cst_123 = arith.constant 1.000000e+00 : f32
      %443 = vector.broadcast %cst_123 : f32 to vector<8x128xf32>
      %444 = arith.subf %443, %381 : vector<8x128xf32>
      %445 = arith.mulf %444, %311 : vector<8x128xf32>
      %446 = arith.addf %442, %445 : vector<8x128xf32>
      %447 = arith.mulf %381, %311 : vector<8x128xf32>
      %cst_124 = arith.constant 1.000000e+00 : f32
      %448 = vector.broadcast %cst_124 : f32 to vector<8x128xf32>
      %449 = arith.subf %448, %386 : vector<8x128xf32>
      %450 = arith.mulf %449, %316 : vector<8x128xf32>
      %451 = arith.addf %447, %450 : vector<8x128xf32>
      %452 = arith.mulf %386, %316 : vector<8x128xf32>
      %cst_125 = arith.constant 1.000000e+00 : f32
      %453 = vector.broadcast %cst_125 : f32 to vector<8x128xf32>
      %454 = arith.subf %453, %391 : vector<8x128xf32>
      %455 = arith.mulf %454, %321 : vector<8x128xf32>
      %456 = arith.addf %452, %455 : vector<8x128xf32>
      %457 = arith.mulf %391, %321 : vector<8x128xf32>
      %cst_126 = arith.constant 1.000000e+00 : f32
      %458 = vector.broadcast %cst_126 : f32 to vector<8x128xf32>
      %459 = arith.subf %458, %396 : vector<8x128xf32>
      %460 = arith.mulf %459, %326 : vector<8x128xf32>
      %461 = arith.addf %457, %460 : vector<8x128xf32>
      %462 = arith.mulf %396, %326 : vector<8x128xf32>
      %cst_127 = arith.constant 1.000000e+00 : f32
      %463 = vector.broadcast %cst_127 : f32 to vector<8x128xf32>
      %464 = arith.subf %463, %401 : vector<8x128xf32>
      %465 = arith.mulf %464, %331 : vector<8x128xf32>
      %466 = arith.addf %462, %465 : vector<8x128xf32>
      %467 = arith.mulf %401, %331 : vector<8x128xf32>
      %cst_128 = arith.constant 1.000000e+00 : f32
      %468 = vector.broadcast %cst_128 : f32 to vector<8x128xf32>
      %469 = arith.subf %468, %406 : vector<8x128xf32>
      %470 = arith.mulf %469, %336 : vector<8x128xf32>
      %471 = arith.addf %467, %470 : vector<8x128xf32>
      %472 = arith.mulf %406, %336 : vector<8x128xf32>
      %cst_129 = arith.constant 1.000000e+00 : f32
      %473 = vector.broadcast %cst_129 : f32 to vector<8x128xf32>
      %474 = arith.subf %473, %411 : vector<8x128xf32>
      %475 = arith.mulf %474, %341 : vector<8x128xf32>
      %476 = arith.addf %472, %475 : vector<8x128xf32>
      %c29 = arith.constant 29 : index
      %c0_130 = arith.constant 0 : index
      %477 = vector.load %arg4[%c29, %c0_130] : memref<65x128xf32, #tpu.memory_space<vmem>>, vector<1x128xf32>
      %478 = vector.shape_cast %477 : vector<1x128xf32> to vector<128xf32>
      %479 = vector.shape_cast %478 : vector<128xf32> to vector<1x128xf32>
      %480 = vector.broadcast %479 : vector<1x128xf32> to vector<8x128xf32>
      %481 = arith.mulf %16, %480 : vector<8x128xf32>
      %c30 = arith.constant 30 : index
      %c0_131 = arith.constant 0 : index
      %482 = vector.load %arg4[%c30, %c0_131] : memref<65x128xf32, #tpu.memory_space<vmem>>, vector<1x128xf32>
      %483 = vector.shape_cast %482 : vector<1x128xf32> to vector<128xf32>
      %484 = vector.shape_cast %483 : vector<128xf32> to vector<1x128xf32>
      %485 = vector.broadcast %484 : vector<1x128xf32> to vector<8x128xf32>
      %486 = arith.mulf %21, %485 : vector<8x128xf32>
      %c31 = arith.constant 31 : index
      %c0_132 = arith.constant 0 : index
      %487 = vector.load %arg4[%c31, %c0_132] : memref<65x128xf32, #tpu.memory_space<vmem>>, vector<1x128xf32>
      %488 = vector.shape_cast %487 : vector<1x128xf32> to vector<128xf32>
      %489 = vector.shape_cast %488 : vector<128xf32> to vector<1x128xf32>
      %490 = vector.broadcast %489 : vector<1x128xf32> to vector<8x128xf32>
      %491 = arith.mulf %26, %490 : vector<8x128xf32>
      %c32 = arith.constant 32 : index
      %c0_133 = arith.constant 0 : index
      %492 = vector.load %arg4[%c32, %c0_133] : memref<65x128xf32, #tpu.memory_space<vmem>>, vector<1x128xf32>
      %493 = vector.shape_cast %492 : vector<1x128xf32> to vector<128xf32>
      %494 = vector.shape_cast %493 : vector<128xf32> to vector<1x128xf32>
      %495 = vector.broadcast %494 : vector<1x128xf32> to vector<8x128xf32>
      %496 = arith.mulf %31, %495 : vector<8x128xf32>
      %c33 = arith.constant 33 : index
      %c0_134 = arith.constant 0 : index
      %497 = vector.load %arg4[%c33, %c0_134] : memref<65x128xf32, #tpu.memory_space<vmem>>, vector<1x128xf32>
      %498 = vector.shape_cast %497 : vector<1x128xf32> to vector<128xf32>
      %499 = vector.shape_cast %498 : vector<128xf32> to vector<1x128xf32>
      %500 = vector.broadcast %499 : vector<1x128xf32> to vector<8x128xf32>
      %501 = arith.mulf %36, %500 : vector<8x128xf32>
      %c34 = arith.constant 34 : index
      %c0_135 = arith.constant 0 : index
      %502 = vector.load %arg4[%c34, %c0_135] : memref<65x128xf32, #tpu.memory_space<vmem>>, vector<1x128xf32>
      %503 = vector.shape_cast %502 : vector<1x128xf32> to vector<128xf32>
      %504 = vector.shape_cast %503 : vector<128xf32> to vector<1x128xf32>
      %505 = vector.broadcast %504 : vector<1x128xf32> to vector<8x128xf32>
      %506 = arith.mulf %41, %505 : vector<8x128xf32>
      %c35 = arith.constant 35 : index
      %c0_136 = arith.constant 0 : index
      %507 = vector.load %arg4[%c35, %c0_136] : memref<65x128xf32, #tpu.memory_space<vmem>>, vector<1x128xf32>
      %508 = vector.shape_cast %507 : vector<1x128xf32> to vector<128xf32>
      %509 = vector.shape_cast %508 : vector<128xf32> to vector<1x128xf32>
      %510 = vector.broadcast %509 : vector<1x128xf32> to vector<8x128xf32>
      %511 = arith.mulf %46, %510 : vector<8x128xf32>
      %c36 = arith.constant 36 : index
      %c0_137 = arith.constant 0 : index
      %512 = vector.load %arg4[%c36, %c0_137] : memref<65x128xf32, #tpu.memory_space<vmem>>, vector<1x128xf32>
      %513 = vector.shape_cast %512 : vector<1x128xf32> to vector<128xf32>
      %514 = vector.shape_cast %513 : vector<128xf32> to vector<1x128xf32>
      %515 = vector.broadcast %514 : vector<1x128xf32> to vector<8x128xf32>
      %516 = arith.mulf %51, %515 : vector<8x128xf32>
      %c37 = arith.constant 37 : index
      %c0_138 = arith.constant 0 : index
      %517 = vector.load %arg4[%c37, %c0_138] : memref<65x128xf32, #tpu.memory_space<vmem>>, vector<1x128xf32>
      %518 = vector.shape_cast %517 : vector<1x128xf32> to vector<128xf32>
      %519 = vector.shape_cast %518 : vector<128xf32> to vector<1x128xf32>
      %520 = vector.broadcast %519 : vector<1x128xf32> to vector<8x128xf32>
      %521 = arith.mulf %56, %520 : vector<8x128xf32>
      %c38 = arith.constant 38 : index
      %c0_139 = arith.constant 0 : index
      %522 = vector.load %arg4[%c38, %c0_139] : memref<65x128xf32, #tpu.memory_space<vmem>>, vector<1x128xf32>
      %523 = vector.shape_cast %522 : vector<1x128xf32> to vector<128xf32>
      %524 = vector.shape_cast %523 : vector<128xf32> to vector<1x128xf32>
      %525 = vector.broadcast %524 : vector<1x128xf32> to vector<8x128xf32>
      %526 = arith.mulf %61, %525 : vector<8x128xf32>
      %c39 = arith.constant 39 : index
      %c0_140 = arith.constant 0 : index
      %527 = vector.load %arg4[%c39, %c0_140] : memref<65x128xf32, #tpu.memory_space<vmem>>, vector<1x128xf32>
      %528 = vector.shape_cast %527 : vector<1x128xf32> to vector<128xf32>
      %529 = vector.shape_cast %528 : vector<128xf32> to vector<1x128xf32>
      %530 = vector.broadcast %529 : vector<1x128xf32> to vector<8x128xf32>
      %531 = arith.mulf %66, %530 : vector<8x128xf32>
      %c40 = arith.constant 40 : index
      %c0_141 = arith.constant 0 : index
      %532 = vector.load %arg4[%c40, %c0_141] : memref<65x128xf32, #tpu.memory_space<vmem>>, vector<1x128xf32>
      %533 = vector.shape_cast %532 : vector<1x128xf32> to vector<128xf32>
      %534 = vector.shape_cast %533 : vector<128xf32> to vector<1x128xf32>
      %535 = vector.broadcast %534 : vector<1x128xf32> to vector<8x128xf32>
      %536 = arith.mulf %71, %535 : vector<8x128xf32>
      %c41 = arith.constant 41 : index
      %c0_142 = arith.constant 0 : index
      %537 = vector.load %arg4[%c41, %c0_142] : memref<65x128xf32, #tpu.memory_space<vmem>>, vector<1x128xf32>
      %538 = vector.shape_cast %537 : vector<1x128xf32> to vector<128xf32>
      %539 = vector.shape_cast %538 : vector<128xf32> to vector<1x128xf32>
      %540 = vector.broadcast %539 : vector<1x128xf32> to vector<8x128xf32>
      %541 = arith.mulf %76, %540 : vector<8x128xf32>
      %542 = arith.mulf %481, %416 : vector<8x128xf32>
      %cst_143 = arith.constant 1.000000e+00 : f32
      %543 = vector.broadcast %cst_143 : f32 to vector<8x128xf32>
      %544 = arith.subf %543, %486 : vector<8x128xf32>
      %545 = arith.mulf %544, %421 : vector<8x128xf32>
      %546 = arith.addf %542, %545 : vector<8x128xf32>
      %547 = arith.mulf %486, %421 : vector<8x128xf32>
      %cst_144 = arith.constant 1.000000e+00 : f32
      %548 = vector.broadcast %cst_144 : f32 to vector<8x128xf32>
      %549 = arith.subf %548, %491 : vector<8x128xf32>
      %550 = arith.mulf %549, %426 : vector<8x128xf32>
      %551 = arith.addf %547, %550 : vector<8x128xf32>
      %552 = arith.mulf %491, %426 : vector<8x128xf32>
      %cst_145 = arith.constant 1.000000e+00 : f32
      %553 = vector.broadcast %cst_145 : f32 to vector<8x128xf32>
      %554 = arith.subf %553, %496 : vector<8x128xf32>
      %555 = arith.mulf %554, %431 : vector<8x128xf32>
      %556 = arith.addf %552, %555 : vector<8x128xf32>
      %557 = arith.mulf %496, %431 : vector<8x128xf32>
      %cst_146 = arith.constant 1.000000e+00 : f32
      %558 = vector.broadcast %cst_146 : f32 to vector<8x128xf32>
      %559 = arith.subf %558, %501 : vector<8x128xf32>
      %560 = arith.mulf %559, %436 : vector<8x128xf32>
      %561 = arith.addf %557, %560 : vector<8x128xf32>
      %562 = arith.mulf %501, %436 : vector<8x128xf32>
      %cst_147 = arith.constant 1.000000e+00 : f32
      %563 = vector.broadcast %cst_147 : f32 to vector<8x128xf32>
      %564 = arith.subf %563, %506 : vector<8x128xf32>
      %565 = arith.mulf %564, %441 : vector<8x128xf32>
      %566 = arith.addf %562, %565 : vector<8x128xf32>
      %567 = arith.mulf %506, %441 : vector<8x128xf32>
      %cst_148 = arith.constant 1.000000e+00 : f32
      %568 = vector.broadcast %cst_148 : f32 to vector<8x128xf32>
      %569 = arith.subf %568, %511 : vector<8x128xf32>
      %570 = arith.mulf %569, %446 : vector<8x128xf32>
      %571 = arith.addf %567, %570 : vector<8x128xf32>
      %572 = arith.mulf %511, %446 : vector<8x128xf32>
      %cst_149 = arith.constant 1.000000e+00 : f32
      %573 = vector.broadcast %cst_149 : f32 to vector<8x128xf32>
      %574 = arith.subf %573, %516 : vector<8x128xf32>
      %575 = arith.mulf %574, %451 : vector<8x128xf32>
      %576 = arith.addf %572, %575 : vector<8x128xf32>
      %577 = arith.mulf %516, %451 : vector<8x128xf32>
      %cst_150 = arith.constant 1.000000e+00 : f32
      %578 = vector.broadcast %cst_150 : f32 to vector<8x128xf32>
      %579 = arith.subf %578, %521 : vector<8x128xf32>
      %580 = arith.mulf %579, %456 : vector<8x128xf32>
      %581 = arith.addf %577, %580 : vector<8x128xf32>
      %582 = arith.mulf %521, %456 : vector<8x128xf32>
      %cst_151 = arith.constant 1.000000e+00 : f32
      %583 = vector.broadcast %cst_151 : f32 to vector<8x128xf32>
      %584 = arith.subf %583, %526 : vector<8x128xf32>
      %585 = arith.mulf %584, %461 : vector<8x128xf32>
      %586 = arith.addf %582, %585 : vector<8x128xf32>
      %587 = arith.mulf %526, %461 : vector<8x128xf32>
      %cst_152 = arith.constant 1.000000e+00 : f32
      %588 = vector.broadcast %cst_152 : f32 to vector<8x128xf32>
      %589 = arith.subf %588, %531 : vector<8x128xf32>
      %590 = arith.mulf %589, %466 : vector<8x128xf32>
      %591 = arith.addf %587, %590 : vector<8x128xf32>
      %592 = arith.mulf %531, %466 : vector<8x128xf32>
      %cst_153 = arith.constant 1.000000e+00 : f32
      %593 = vector.broadcast %cst_153 : f32 to vector<8x128xf32>
      %594 = arith.subf %593, %536 : vector<8x128xf32>
      %595 = arith.mulf %594, %471 : vector<8x128xf32>
      %596 = arith.addf %592, %595 : vector<8x128xf32>
      %597 = arith.mulf %536, %471 : vector<8x128xf32>
      %cst_154 = arith.constant 1.000000e+00 : f32
      %598 = vector.broadcast %cst_154 : f32 to vector<8x128xf32>
      %599 = arith.subf %598, %541 : vector<8x128xf32>
      %600 = arith.mulf %599, %476 : vector<8x128xf32>
      %601 = arith.addf %597, %600 : vector<8x128xf32>
      %c42 = arith.constant 42 : index
      %c0_155 = arith.constant 0 : index
      %602 = vector.load %arg4[%c42, %c0_155] : memref<65x128xf32, #tpu.memory_space<vmem>>, vector<1x128xf32>
      %603 = vector.shape_cast %602 : vector<1x128xf32> to vector<128xf32>
      %604 = vector.shape_cast %603 : vector<128xf32> to vector<1x128xf32>
      %605 = vector.broadcast %604 : vector<1x128xf32> to vector<8x128xf32>
      %606 = arith.mulf %16, %605 : vector<8x128xf32>
      %c43 = arith.constant 43 : index
      %c0_156 = arith.constant 0 : index
      %607 = vector.load %arg4[%c43, %c0_156] : memref<65x128xf32, #tpu.memory_space<vmem>>, vector<1x128xf32>
      %608 = vector.shape_cast %607 : vector<1x128xf32> to vector<128xf32>
      %609 = vector.shape_cast %608 : vector<128xf32> to vector<1x128xf32>
      %610 = vector.broadcast %609 : vector<1x128xf32> to vector<8x128xf32>
      %611 = arith.mulf %21, %610 : vector<8x128xf32>
      %c44 = arith.constant 44 : index
      %c0_157 = arith.constant 0 : index
      %612 = vector.load %arg4[%c44, %c0_157] : memref<65x128xf32, #tpu.memory_space<vmem>>, vector<1x128xf32>
      %613 = vector.shape_cast %612 : vector<1x128xf32> to vector<128xf32>
      %614 = vector.shape_cast %613 : vector<128xf32> to vector<1x128xf32>
      %615 = vector.broadcast %614 : vector<1x128xf32> to vector<8x128xf32>
      %616 = arith.mulf %26, %615 : vector<8x128xf32>
      %c45 = arith.constant 45 : index
      %c0_158 = arith.constant 0 : index
      %617 = vector.load %arg4[%c45, %c0_158] : memref<65x128xf32, #tpu.memory_space<vmem>>, vector<1x128xf32>
      %618 = vector.shape_cast %617 : vector<1x128xf32> to vector<128xf32>
      %619 = vector.shape_cast %618 : vector<128xf32> to vector<1x128xf32>
      %620 = vector.broadcast %619 : vector<1x128xf32> to vector<8x128xf32>
      %621 = arith.mulf %31, %620 : vector<8x128xf32>
      %c46 = arith.constant 46 : index
      %c0_159 = arith.constant 0 : index
      %622 = vector.load %arg4[%c46, %c0_159] : memref<65x128xf32, #tpu.memory_space<vmem>>, vector<1x128xf32>
      %623 = vector.shape_cast %622 : vector<1x128xf32> to vector<128xf32>
      %624 = vector.shape_cast %623 : vector<128xf32> to vector<1x128xf32>
      %625 = vector.broadcast %624 : vector<1x128xf32> to vector<8x128xf32>
      %626 = arith.mulf %36, %625 : vector<8x128xf32>
      %c47 = arith.constant 47 : index
      %c0_160 = arith.constant 0 : index
      %627 = vector.load %arg4[%c47, %c0_160] : memref<65x128xf32, #tpu.memory_space<vmem>>, vector<1x128xf32>
      %628 = vector.shape_cast %627 : vector<1x128xf32> to vector<128xf32>
      %629 = vector.shape_cast %628 : vector<128xf32> to vector<1x128xf32>
      %630 = vector.broadcast %629 : vector<1x128xf32> to vector<8x128xf32>
      %631 = arith.mulf %41, %630 : vector<8x128xf32>
      %c48 = arith.constant 48 : index
      %c0_161 = arith.constant 0 : index
      %632 = vector.load %arg4[%c48, %c0_161] : memref<65x128xf32, #tpu.memory_space<vmem>>, vector<1x128xf32>
      %633 = vector.shape_cast %632 : vector<1x128xf32> to vector<128xf32>
      %634 = vector.shape_cast %633 : vector<128xf32> to vector<1x128xf32>
      %635 = vector.broadcast %634 : vector<1x128xf32> to vector<8x128xf32>
      %636 = arith.mulf %46, %635 : vector<8x128xf32>
      %c49 = arith.constant 49 : index
      %c0_162 = arith.constant 0 : index
      %637 = vector.load %arg4[%c49, %c0_162] : memref<65x128xf32, #tpu.memory_space<vmem>>, vector<1x128xf32>
      %638 = vector.shape_cast %637 : vector<1x128xf32> to vector<128xf32>
      %639 = vector.shape_cast %638 : vector<128xf32> to vector<1x128xf32>
      %640 = vector.broadcast %639 : vector<1x128xf32> to vector<8x128xf32>
      %641 = arith.mulf %51, %640 : vector<8x128xf32>
      %c50 = arith.constant 50 : index
      %c0_163 = arith.constant 0 : index
      %642 = vector.load %arg4[%c50, %c0_163] : memref<65x128xf32, #tpu.memory_space<vmem>>, vector<1x128xf32>
      %643 = vector.shape_cast %642 : vector<1x128xf32> to vector<128xf32>
      %644 = vector.shape_cast %643 : vector<128xf32> to vector<1x128xf32>
      %645 = vector.broadcast %644 : vector<1x128xf32> to vector<8x128xf32>
      %646 = arith.mulf %56, %645 : vector<8x128xf32>
      %c51 = arith.constant 51 : index
      %c0_164 = arith.constant 0 : index
      %647 = vector.load %arg4[%c51, %c0_164] : memref<65x128xf32, #tpu.memory_space<vmem>>, vector<1x128xf32>
      %648 = vector.shape_cast %647 : vector<1x128xf32> to vector<128xf32>
      %649 = vector.shape_cast %648 : vector<128xf32> to vector<1x128xf32>
      %650 = vector.broadcast %649 : vector<1x128xf32> to vector<8x128xf32>
      %651 = arith.mulf %61, %650 : vector<8x128xf32>
      %c52 = arith.constant 52 : index
      %c0_165 = arith.constant 0 : index
      %652 = vector.load %arg4[%c52, %c0_165] : memref<65x128xf32, #tpu.memory_space<vmem>>, vector<1x128xf32>
      %653 = vector.shape_cast %652 : vector<1x128xf32> to vector<128xf32>
      %654 = vector.shape_cast %653 : vector<128xf32> to vector<1x128xf32>
      %655 = vector.broadcast %654 : vector<1x128xf32> to vector<8x128xf32>
      %656 = arith.mulf %66, %655 : vector<8x128xf32>
      %c53 = arith.constant 53 : index
      %c0_166 = arith.constant 0 : index
      %657 = vector.load %arg4[%c53, %c0_166] : memref<65x128xf32, #tpu.memory_space<vmem>>, vector<1x128xf32>
      %658 = vector.shape_cast %657 : vector<1x128xf32> to vector<128xf32>
      %659 = vector.shape_cast %658 : vector<128xf32> to vector<1x128xf32>
      %660 = vector.broadcast %659 : vector<1x128xf32> to vector<8x128xf32>
      %661 = arith.mulf %71, %660 : vector<8x128xf32>
      %662 = arith.mulf %606, %546 : vector<8x128xf32>
      %cst_167 = arith.constant 1.000000e+00 : f32
      %663 = vector.broadcast %cst_167 : f32 to vector<8x128xf32>
      %664 = arith.subf %663, %611 : vector<8x128xf32>
      %665 = arith.mulf %664, %551 : vector<8x128xf32>
      %666 = arith.addf %662, %665 : vector<8x128xf32>
      %667 = arith.mulf %611, %551 : vector<8x128xf32>
      %cst_168 = arith.constant 1.000000e+00 : f32
      %668 = vector.broadcast %cst_168 : f32 to vector<8x128xf32>
      %669 = arith.subf %668, %616 : vector<8x128xf32>
      %670 = arith.mulf %669, %556 : vector<8x128xf32>
      %671 = arith.addf %667, %670 : vector<8x128xf32>
      %672 = arith.mulf %616, %556 : vector<8x128xf32>
      %cst_169 = arith.constant 1.000000e+00 : f32
      %673 = vector.broadcast %cst_169 : f32 to vector<8x128xf32>
      %674 = arith.subf %673, %621 : vector<8x128xf32>
      %675 = arith.mulf %674, %561 : vector<8x128xf32>
      %676 = arith.addf %672, %675 : vector<8x128xf32>
      %677 = arith.mulf %621, %561 : vector<8x128xf32>
      %cst_170 = arith.constant 1.000000e+00 : f32
      %678 = vector.broadcast %cst_170 : f32 to vector<8x128xf32>
      %679 = arith.subf %678, %626 : vector<8x128xf32>
      %680 = arith.mulf %679, %566 : vector<8x128xf32>
      %681 = arith.addf %677, %680 : vector<8x128xf32>
      %682 = arith.mulf %626, %566 : vector<8x128xf32>
      %cst_171 = arith.constant 1.000000e+00 : f32
      %683 = vector.broadcast %cst_171 : f32 to vector<8x128xf32>
      %684 = arith.subf %683, %631 : vector<8x128xf32>
      %685 = arith.mulf %684, %571 : vector<8x128xf32>
      %686 = arith.addf %682, %685 : vector<8x128xf32>
      %687 = arith.mulf %631, %571 : vector<8x128xf32>
      %cst_172 = arith.constant 1.000000e+00 : f32
      %688 = vector.broadcast %cst_172 : f32 to vector<8x128xf32>
      %689 = arith.subf %688, %636 : vector<8x128xf32>
      %690 = arith.mulf %689, %576 : vector<8x128xf32>
      %691 = arith.addf %687, %690 : vector<8x128xf32>
      %692 = arith.mulf %636, %576 : vector<8x128xf32>
      %cst_173 = arith.constant 1.000000e+00 : f32
      %693 = vector.broadcast %cst_173 : f32 to vector<8x128xf32>
      %694 = arith.subf %693, %641 : vector<8x128xf32>
      %695 = arith.mulf %694, %581 : vector<8x128xf32>
      %696 = arith.addf %692, %695 : vector<8x128xf32>
      %697 = arith.mulf %641, %581 : vector<8x128xf32>
      %cst_174 = arith.constant 1.000000e+00 : f32
      %698 = vector.broadcast %cst_174 : f32 to vector<8x128xf32>
      %699 = arith.subf %698, %646 : vector<8x128xf32>
      %700 = arith.mulf %699, %586 : vector<8x128xf32>
      %701 = arith.addf %697, %700 : vector<8x128xf32>
      %702 = arith.mulf %646, %586 : vector<8x128xf32>
      %cst_175 = arith.constant 1.000000e+00 : f32
      %703 = vector.broadcast %cst_175 : f32 to vector<8x128xf32>
      %704 = arith.subf %703, %651 : vector<8x128xf32>
      %705 = arith.mulf %704, %591 : vector<8x128xf32>
      %706 = arith.addf %702, %705 : vector<8x128xf32>
      %707 = arith.mulf %651, %591 : vector<8x128xf32>
      %cst_176 = arith.constant 1.000000e+00 : f32
      %708 = vector.broadcast %cst_176 : f32 to vector<8x128xf32>
      %709 = arith.subf %708, %656 : vector<8x128xf32>
      %710 = arith.mulf %709, %596 : vector<8x128xf32>
      %711 = arith.addf %707, %710 : vector<8x128xf32>
      %712 = arith.mulf %656, %596 : vector<8x128xf32>
      %cst_177 = arith.constant 1.000000e+00 : f32
      %713 = vector.broadcast %cst_177 : f32 to vector<8x128xf32>
      %714 = arith.subf %713, %661 : vector<8x128xf32>
      %715 = arith.mulf %714, %601 : vector<8x128xf32>
      %716 = arith.addf %712, %715 : vector<8x128xf32>
      %c54 = arith.constant 54 : index
      %c0_178 = arith.constant 0 : index
      %717 = vector.load %arg4[%c54, %c0_178] : memref<65x128xf32, #tpu.memory_space<vmem>>, vector<1x128xf32>
      %718 = vector.shape_cast %717 : vector<1x128xf32> to vector<128xf32>
      %719 = vector.shape_cast %718 : vector<128xf32> to vector<1x128xf32>
      %720 = vector.broadcast %719 : vector<1x128xf32> to vector<8x128xf32>
      %721 = arith.mulf %16, %720 : vector<8x128xf32>
      %c55 = arith.constant 55 : index
      %c0_179 = arith.constant 0 : index
      %722 = vector.load %arg4[%c55, %c0_179] : memref<65x128xf32, #tpu.memory_space<vmem>>, vector<1x128xf32>
      %723 = vector.shape_cast %722 : vector<1x128xf32> to vector<128xf32>
      %724 = vector.shape_cast %723 : vector<128xf32> to vector<1x128xf32>
      %725 = vector.broadcast %724 : vector<1x128xf32> to vector<8x128xf32>
      %726 = arith.mulf %21, %725 : vector<8x128xf32>
      %c56 = arith.constant 56 : index
      %c0_180 = arith.constant 0 : index
      %727 = vector.load %arg4[%c56, %c0_180] : memref<65x128xf32, #tpu.memory_space<vmem>>, vector<1x128xf32>
      %728 = vector.shape_cast %727 : vector<1x128xf32> to vector<128xf32>
      %729 = vector.shape_cast %728 : vector<128xf32> to vector<1x128xf32>
      %730 = vector.broadcast %729 : vector<1x128xf32> to vector<8x128xf32>
      %731 = arith.mulf %26, %730 : vector<8x128xf32>
      %c57 = arith.constant 57 : index
      %c0_181 = arith.constant 0 : index
      %732 = vector.load %arg4[%c57, %c0_181] : memref<65x128xf32, #tpu.memory_space<vmem>>, vector<1x128xf32>
      %733 = vector.shape_cast %732 : vector<1x128xf32> to vector<128xf32>
      %734 = vector.shape_cast %733 : vector<128xf32> to vector<1x128xf32>
      %735 = vector.broadcast %734 : vector<1x128xf32> to vector<8x128xf32>
      %736 = arith.mulf %31, %735 : vector<8x128xf32>
      %c58 = arith.constant 58 : index
      %c0_182 = arith.constant 0 : index
      %737 = vector.load %arg4[%c58, %c0_182] : memref<65x128xf32, #tpu.memory_space<vmem>>, vector<1x128xf32>
      %738 = vector.shape_cast %737 : vector<1x128xf32> to vector<128xf32>
      %739 = vector.shape_cast %738 : vector<128xf32> to vector<1x128xf32>
      %740 = vector.broadcast %739 : vector<1x128xf32> to vector<8x128xf32>
      %741 = arith.mulf %36, %740 : vector<8x128xf32>
      %c59 = arith.constant 59 : index
      %c0_183 = arith.constant 0 : index
      %742 = vector.load %arg4[%c59, %c0_183] : memref<65x128xf32, #tpu.memory_space<vmem>>, vector<1x128xf32>
      %743 = vector.shape_cast %742 : vector<1x128xf32> to vector<128xf32>
      %744 = vector.shape_cast %743 : vector<128xf32> to vector<1x128xf32>
      %745 = vector.broadcast %744 : vector<1x128xf32> to vector<8x128xf32>
      %746 = arith.mulf %41, %745 : vector<8x128xf32>
      %c60 = arith.constant 60 : index
      %c0_184 = arith.constant 0 : index
      %747 = vector.load %arg4[%c60, %c0_184] : memref<65x128xf32, #tpu.memory_space<vmem>>, vector<1x128xf32>
      %748 = vector.shape_cast %747 : vector<1x128xf32> to vector<128xf32>
      %749 = vector.shape_cast %748 : vector<128xf32> to vector<1x128xf32>
      %750 = vector.broadcast %749 : vector<1x128xf32> to vector<8x128xf32>
      %751 = arith.mulf %46, %750 : vector<8x128xf32>
      %c61 = arith.constant 61 : index
      %c0_185 = arith.constant 0 : index
      %752 = vector.load %arg4[%c61, %c0_185] : memref<65x128xf32, #tpu.memory_space<vmem>>, vector<1x128xf32>
      %753 = vector.shape_cast %752 : vector<1x128xf32> to vector<128xf32>
      %754 = vector.shape_cast %753 : vector<128xf32> to vector<1x128xf32>
      %755 = vector.broadcast %754 : vector<1x128xf32> to vector<8x128xf32>
      %756 = arith.mulf %51, %755 : vector<8x128xf32>
      %c62 = arith.constant 62 : index
      %c0_186 = arith.constant 0 : index
      %757 = vector.load %arg4[%c62, %c0_186] : memref<65x128xf32, #tpu.memory_space<vmem>>, vector<1x128xf32>
      %758 = vector.shape_cast %757 : vector<1x128xf32> to vector<128xf32>
      %759 = vector.shape_cast %758 : vector<128xf32> to vector<1x128xf32>
      %760 = vector.broadcast %759 : vector<1x128xf32> to vector<8x128xf32>
      %761 = arith.mulf %56, %760 : vector<8x128xf32>
      %c63 = arith.constant 63 : index
      %c0_187 = arith.constant 0 : index
      %762 = vector.load %arg4[%c63, %c0_187] : memref<65x128xf32, #tpu.memory_space<vmem>>, vector<1x128xf32>
      %763 = vector.shape_cast %762 : vector<1x128xf32> to vector<128xf32>
      %764 = vector.shape_cast %763 : vector<128xf32> to vector<1x128xf32>
      %765 = vector.broadcast %764 : vector<1x128xf32> to vector<8x128xf32>
      %766 = arith.mulf %61, %765 : vector<8x128xf32>
      %c64 = arith.constant 64 : index
      %c0_188 = arith.constant 0 : index
      %767 = vector.load %arg4[%c64, %c0_188] : memref<65x128xf32, #tpu.memory_space<vmem>>, vector<1x128xf32>
      %768 = vector.shape_cast %767 : vector<1x128xf32> to vector<128xf32>
      %769 = vector.shape_cast %768 : vector<128xf32> to vector<1x128xf32>
      %770 = vector.broadcast %769 : vector<1x128xf32> to vector<8x128xf32>
      %771 = arith.mulf %66, %770 : vector<8x128xf32>
      %772 = arith.mulf %721, %666 : vector<8x128xf32>
      %cst_189 = arith.constant 1.000000e+00 : f32
      %773 = vector.broadcast %cst_189 : f32 to vector<8x128xf32>
      %774 = arith.subf %773, %726 : vector<8x128xf32>
      %775 = arith.mulf %774, %671 : vector<8x128xf32>
      %776 = arith.addf %772, %775 : vector<8x128xf32>
      %777 = arith.mulf %726, %671 : vector<8x128xf32>
      %cst_190 = arith.constant 1.000000e+00 : f32
      %778 = vector.broadcast %cst_190 : f32 to vector<8x128xf32>
      %779 = arith.subf %778, %731 : vector<8x128xf32>
      %780 = arith.mulf %779, %676 : vector<8x128xf32>
      %781 = arith.addf %777, %780 : vector<8x128xf32>
      %782 = arith.mulf %731, %676 : vector<8x128xf32>
      %cst_191 = arith.constant 1.000000e+00 : f32
      %783 = vector.broadcast %cst_191 : f32 to vector<8x128xf32>
      %784 = arith.subf %783, %736 : vector<8x128xf32>
      %785 = arith.mulf %784, %681 : vector<8x128xf32>
      %786 = arith.addf %782, %785 : vector<8x128xf32>
      %787 = arith.mulf %736, %681 : vector<8x128xf32>
      %cst_192 = arith.constant 1.000000e+00 : f32
      %788 = vector.broadcast %cst_192 : f32 to vector<8x128xf32>
      %789 = arith.subf %788, %741 : vector<8x128xf32>
      %790 = arith.mulf %789, %686 : vector<8x128xf32>
      %791 = arith.addf %787, %790 : vector<8x128xf32>
      %792 = arith.mulf %741, %686 : vector<8x128xf32>
      %cst_193 = arith.constant 1.000000e+00 : f32
      %793 = vector.broadcast %cst_193 : f32 to vector<8x128xf32>
      %794 = arith.subf %793, %746 : vector<8x128xf32>
      %795 = arith.mulf %794, %691 : vector<8x128xf32>
      %796 = arith.addf %792, %795 : vector<8x128xf32>
      %797 = arith.mulf %746, %691 : vector<8x128xf32>
      %cst_194 = arith.constant 1.000000e+00 : f32
      %798 = vector.broadcast %cst_194 : f32 to vector<8x128xf32>
      %799 = arith.subf %798, %751 : vector<8x128xf32>
      %800 = arith.mulf %799, %696 : vector<8x128xf32>
      %801 = arith.addf %797, %800 : vector<8x128xf32>
      %802 = arith.mulf %751, %696 : vector<8x128xf32>
      %cst_195 = arith.constant 1.000000e+00 : f32
      %803 = vector.broadcast %cst_195 : f32 to vector<8x128xf32>
      %804 = arith.subf %803, %756 : vector<8x128xf32>
      %805 = arith.mulf %804, %701 : vector<8x128xf32>
      %806 = arith.addf %802, %805 : vector<8x128xf32>
      %807 = arith.mulf %756, %701 : vector<8x128xf32>
      %cst_196 = arith.constant 1.000000e+00 : f32
      %808 = vector.broadcast %cst_196 : f32 to vector<8x128xf32>
      %809 = arith.subf %808, %761 : vector<8x128xf32>
      %810 = arith.mulf %809, %706 : vector<8x128xf32>
      %811 = arith.addf %807, %810 : vector<8x128xf32>
      %812 = arith.mulf %761, %706 : vector<8x128xf32>
      %cst_197 = arith.constant 1.000000e+00 : f32
      %813 = vector.broadcast %cst_197 : f32 to vector<8x128xf32>
      %814 = arith.subf %813, %766 : vector<8x128xf32>
      %815 = arith.mulf %814, %711 : vector<8x128xf32>
      %816 = arith.addf %812, %815 : vector<8x128xf32>
      %817 = arith.mulf %766, %711 : vector<8x128xf32>
      %cst_198 = arith.constant 1.000000e+00 : f32
      %818 = vector.broadcast %cst_198 : f32 to vector<8x128xf32>
      %819 = arith.subf %818, %771 : vector<8x128xf32>
      %820 = arith.mulf %819, %716 : vector<8x128xf32>
      %821 = arith.addf %817, %820 : vector<8x128xf32>
      %822 = arith.truncf %776 : vector<8x128xf32> to vector<8x128xbf16>
      %c0_199 = arith.constant 0 : index
      %c128 = arith.constant 128 : index
      %823 = vector.load %arg7[%c0_199, %c128] : memref<8x1408xbf16, #tpu.memory_space<vmem>>, vector<8x128xbf16>
      tpu.vector_store %arg7[%c0_199, %c128], %822 {strides = array<i32>} : memref<8x1408xbf16, #tpu.memory_space<vmem>>, vector<8x128xbf16>,
      %824 = arith.truncf %781 : vector<8x128xf32> to vector<8x128xbf16>
      %c0_200 = arith.constant 0 : index
      %c256 = arith.constant 256 : index
      %825 = vector.load %arg7[%c0_200, %c256] : memref<8x1408xbf16, #tpu.memory_space<vmem>>, vector<8x128xbf16>
      tpu.vector_store %arg7[%c0_200, %c256], %824 {strides = array<i32>} : memref<8x1408xbf16, #tpu.memory_space<vmem>>, vector<8x128xbf16>,
      %826 = arith.truncf %786 : vector<8x128xf32> to vector<8x128xbf16>
      %c0_201 = arith.constant 0 : index
      %c384 = arith.constant 384 : index
      %827 = vector.load %arg7[%c0_201, %c384] : memref<8x1408xbf16, #tpu.memory_space<vmem>>, vector<8x128xbf16>
      tpu.vector_store %arg7[%c0_201, %c384], %826 {strides = array<i32>} : memref<8x1408xbf16, #tpu.memory_space<vmem>>, vector<8x128xbf16>,
      %828 = arith.truncf %791 : vector<8x128xf32> to vector<8x128xbf16>
      %c0_202 = arith.constant 0 : index
      %c512 = arith.constant 512 : index
      %829 = vector.load %arg7[%c0_202, %c512] : memref<8x1408xbf16, #tpu.memory_space<vmem>>, vector<8x128xbf16>
      tpu.vector_store %arg7[%c0_202, %c512], %828 {strides = array<i32>} : memref<8x1408xbf16, #tpu.memory_space<vmem>>, vector<8x128xbf16>,
      %830 = arith.truncf %796 : vector<8x128xf32> to vector<8x128xbf16>
      %c0_203 = arith.constant 0 : index
      %c640 = arith.constant 640 : index
      %831 = vector.load %arg7[%c0_203, %c640] : memref<8x1408xbf16, #tpu.memory_space<vmem>>, vector<8x128xbf16>
      tpu.vector_store %arg7[%c0_203, %c640], %830 {strides = array<i32>} : memref<8x1408xbf16, #tpu.memory_space<vmem>>, vector<8x128xbf16>,
      %832 = arith.truncf %801 : vector<8x128xf32> to vector<8x128xbf16>
      %c0_204 = arith.constant 0 : index
      %c768 = arith.constant 768 : index
      %833 = vector.load %arg7[%c0_204, %c768] : memref<8x1408xbf16, #tpu.memory_space<vmem>>, vector<8x128xbf16>
      tpu.vector_store %arg7[%c0_204, %c768], %832 {strides = array<i32>} : memref<8x1408xbf16, #tpu.memory_space<vmem>>, vector<8x128xbf16>,
      %834 = arith.truncf %806 : vector<8x128xf32> to vector<8x128xbf16>
      %c0_205 = arith.constant 0 : index
      %c896 = arith.constant 896 : index
      %835 = vector.load %arg7[%c0_205, %c896] : memref<8x1408xbf16, #tpu.memory_space<vmem>>, vector<8x128xbf16>
      tpu.vector_store %arg7[%c0_205, %c896], %834 {strides = array<i32>} : memref<8x1408xbf16, #tpu.memory_space<vmem>>, vector<8x128xbf16>,
      %836 = arith.truncf %811 : vector<8x128xf32> to vector<8x128xbf16>
      %c0_206 = arith.constant 0 : index
      %c1024 = arith.constant 1024 : index
      %837 = vector.load %arg7[%c0_206, %c1024] : memref<8x1408xbf16, #tpu.memory_space<vmem>>, vector<8x128xbf16>
      tpu.vector_store %arg7[%c0_206, %c1024], %836 {strides = array<i32>} : memref<8x1408xbf16, #tpu.memory_space<vmem>>, vector<8x128xbf16>,
      %838 = arith.truncf %816 : vector<8x128xf32> to vector<8x128xbf16>
      %c0_207 = arith.constant 0 : index
      %c1152 = arith.constant 1152 : index
      %839 = vector.load %arg7[%c0_207, %c1152] : memref<8x1408xbf16, #tpu.memory_space<vmem>>, vector<8x128xbf16>
      tpu.vector_store %arg7[%c0_207, %c1152], %838 {strides = array<i32>} : memref<8x1408xbf16, #tpu.memory_space<vmem>>, vector<8x128xbf16>,
      %840 = arith.truncf %821 : vector<8x128xf32> to vector<8x128xbf16>
      %c0_208 = arith.constant 0 : index
      %c1280 = arith.constant 1280 : index
      %841 = vector.load %arg7[%c0_208, %c1280] : memref<8x1408xbf16, #tpu.memory_space<vmem>>, vector<8x128xbf16>
      tpu.vector_store %arg7[%c0_208, %c1280], %840 {strides = array<i32>} : memref<8x1408xbf16, #tpu.memory_space<vmem>>, vector<8x128xbf16>,
    } else {
    }
    %c0 = arith.constant 0 : index
    %c0_1 = arith.constant 0 : index
    %3 = vector.load %arg7[%c0, %c0_1] : memref<8x1408xbf16, #tpu.memory_space<vmem>>, vector<8x1408xbf16>
    %c0_2 = arith.constant 0 : index
    %c0_3 = arith.constant 0 : index
    %4 = vector.load %arg5[%c0_2, %c0_3] : memref<1408x128xbf16, #tpu.memory_space<vmem>>, vector<1408x128xbf16>
    %cst = arith.constant dense<0.000000e+00> : vector<8x128xf32>
    %5 = tpu.matmul %3, %4, %cst {dimension_numbers = #tpu.dot_dimension_numbers<[1], [0], [0], [1], [0, 0, 1, 1], [], []>} : vector<8x1408xbf16>, vector<1408x128xbf16>, vector<8x128xf32> -> vector<8x128xf32>
    %c0_4 = arith.constant 0 : index
    %c0_5 = arith.constant 0 : index
    %6 = vector.load %arg6[%c0_4, %c0_5] : memref<8x128xf32, #tpu.memory_space<vmem>>, vector<8x128xf32>
    tpu.vector_store %arg6[%c0_4, %c0_5], %5 {strides = array<i32>} : memref<8x128xf32, #tpu.memory_space<vmem>>, vector<8x128xf32>,
    return
  }
  func.func @transform_0(%arg0: i32, %arg1: i32) -> (i32, i32) {
    %c0_i32 = arith.constant 0 : i32
    %c0_i32_0 = arith.constant 0 : i32
    return %arg0, %c0_i32 : i32, i32
  }
  func.func @transform_1(%arg0: i32, %arg1: i32) -> (i32, i32) {
    %c0_i32 = arith.constant 0 : i32
    %c0_i32_0 = arith.constant 0 : i32
    %c0_i32_1 = arith.constant 0 : i32
    return %c0_i32, %c0_i32_0 : i32, i32
  }
  func.func @transform_2(%arg0: i32, %arg1: i32) -> (i32, i32) {
    %c0_i32 = arith.constant 0 : i32
    %c0_i32_0 = arith.constant 0 : i32
    %c0_i32_1 = arith.constant 0 : i32
    return %c0_i32, %c0_i32_0 : i32, i32
  }
  func.func @transform_3(%arg0: i32, %arg1: i32) -> (i32, i32) {
    %c0_i32 = arith.constant 0 : i32
    %c0_i32_0 = arith.constant 0 : i32
    return %c0_i32, %arg1 : i32, i32
  }
  func.func @transform_4(%arg0: i32, %arg1: i32) -> (i32, i32) {
    %c0_i32 = arith.constant 0 : i32
    return %arg0, %arg1 : i32, i32
  }
}

</mosaic_0001>

<bundles_post_ra>
// kernel: tpu_custom_call.1
= control target key start
LH: loop header
LB: loop body
LE: loop exit
PB: predicated region body
PF: predicated region fallthrough
CT: control target
= control target key end

     0   :  { %9 = vsyncpa [#allocation4], 0  ;;  %s2867_s0 = inlined_call_operand.hbm [shape: f32[8,128], index: 0, kind: input, shape index: {}]   ;;  %s2868_s1 = inlined_call_operand.hbm [shape: f32[16,128], index: 1, kind: input, shape index: {}]   ;;  %s2869_s2 = inlined_call_operand.hbm [shape: f32[65,128], index: 2, kind: input, shape index: {}]   ;;  %s2870_s3 = inlined_call_operand.hbm [shape: bf16[1408,128], index: 3, kind: input, shape index: {}]   ;;  %s2871_s4 = inlined_call_operand.hbm [shape: f32[8,128], index: 4, kind: output, shape index: {}]  }
   0x1   :  { %10 = vsyncpa [#allocation7], 0 }
   0x2   :  { %11 = vsyncpa [#allocation10], 0 }
   0x3   :  { %12 = vsyncpa [#allocation5], 0  ;;  %s2485_s15 = smov [#allocation6]  }
   0x4   :  { %s28_s16 = sshll.u32 %s2485_s15, 4  ;;  %s29_s16 = int_to_ptr.vmem [resolvable:$true] %s28_s16 }
   0x5   :  { %s2385_s17 = scalar_lea.vmem %s29_s16, 256  ;;  %p2390_p1 = scmp.lt.s32.totalorder %s29_s16, %s29_s16 }
   0x6   :  { %p2386_p0 = scmp.ne.s32.totalorder %s29_s16, %s2385_s17  ;;  %p2391_p2 = scmp.lt.s32.totalorder %s2385_s17, %s2385_s17 }
   0x8   :  { %p2392_p3 = por %p2391_p2, %p2390_p1 }
   0xa   :  { %p2393_p4 = pnand %p2392_p3, %p2386_p0 }
   0xc   :  { %2396 = shalt.err (!%p2393_p4)
}
   0xd   :  { %s2486_s18 = smov 128   ;;  %s2487_s19 = smov 8  }
   0xe   :  { %34 = dma.hbm_to_vmem [thread:$0]  %s2868_s1, 256, %s29_s16, [#allocation7], %s2486_s18, %s2486_s18, %s2487_s19  }
   0xf   :  { %s2488_s22 = smov [#allocation3]   ;;  %s2489_s24 = smov [#allocation8]  }
  0x10   :  { %s19_s23 = sshll.u32 %s2488_s22, 4  ;;  %s40_s25 = sshll.u32 %s2489_s24, 4  ;;  %s20_s23 = int_to_ptr.vmem [resolvable:$true] %s19_s23  ;;  %s41_s25 = int_to_ptr.vmem [resolvable:$true] %s40_s25 }
  0x11   :  { %s2405_s26 = scalar_lea.vmem %s20_s23, 128  ;;  %p2410_p6 = scmp.lt.s32.totalorder %s20_s23, %s20_s23 }
  0x12   :  { %p2406_p5 = scmp.ne.s32.totalorder %s20_s23, %s2405_s26  ;;  %p2411_p7 = scmp.lt.s32.totalorder %s2405_s26, %s2405_s26 }
  0x14   :  { %p2412_p8 = por %p2411_p7, %p2410_p6 }
  0x16   :  { %p2413_p9 = pnand %p2412_p8, %p2406_p5 }
  0x18   :  { %2416 = shalt.err (!%p2413_p9)
}
  0x19   :  { %22 = dma.hbm_to_vmem [thread:$0]  %s2867_s0, 128, %s20_s23, [#allocation4]  }
  0x1a   :  { %s2425_s29 = scalar_lea.vmem %s41_s25, 1152  ;;  %p2430_p11 = scmp.lt.s32.totalorder %s41_s25, %s41_s25 }
  0x1b   :  { %p2426_p10 = scmp.ne.s32.totalorder %s41_s25, %s2425_s29  ;;  %p2431_p12 = scmp.lt.s32.totalorder %s2425_s29, %s2425_s29 }
  0x1d   :  { %p2432_p13 = por %p2431_p12, %p2430_p11 }
  0x1f   :  { %p2433_p0 = pnand %p2432_p13, %p2426_p10 }
  0x21   :  { %2436 = shalt.err (!%p2433_p0)
}
  0x22   :  { %46 = dma.hbm_to_vmem [thread:$0]  %s2869_s2, 1152, %s41_s25, [#allocation7], %s2486_s18, %s2486_s18, %s2487_s19  }
  0x23   :  { %s2490_s5 = smov [#allocation9]  }
  0x24   :  { %s52_s6 = sshll.u32 %s2490_s5, 4  ;;  %s53_s6 = int_to_ptr.vmem [resolvable:$true] %s52_s6 }
  0x25   :  { %s2445_s7 = scalar_lea.vmem %s53_s6, 11264  ;;  %p2450_p2 = scmp.lt.s32.totalorder %s53_s6, %s53_s6 }
  0x26   :  { %p2446_p1 = scmp.ne.s32.totalorder %s53_s6, %s2445_s7  ;;  %p2451_p3 = scmp.lt.s32.totalorder %s2445_s7, %s2445_s7 }
  0x28   :  { %p2452_p4 = por %p2451_p3, %p2450_p2 }
  0x2a   :  { %p2453_p5 = pnand %p2452_p4, %p2446_p1 }
  0x2c   :  { %2456 = shalt.err (!%p2453_p5)
}
  0x2d   :  { %s2491_s0 = smov 64   ;;  %s2492_s8 = smov 4  }
  0x2e   :  { %58 = dma.hbm_to_vmem [thread:$0]  %s2870_s3, 11264, %s53_s6, [#allocation10], %s2491_s0, %s2491_s0, %s2492_s8  }
  0x2f   :  { %2477 = dma.done.wait [#allocation4], 128  }
  0x30   :  { %2478 = vsyncadd [#allocation4], 4294967168 }
  0x31   :  { %2479 = dma.done.wait [#allocation7], 1408  }
  0x32   :  { %2480 = vsyncadd [#allocation7], 4294965888 }
  0x33   :  { %2481 = dma.done.wait [#allocation10], 11264  }
  0x34   :  { %2482 = vsyncadd [#allocation10], 4294956032  ;;  %v2277_v0 = vld [vmem:[#allocation9 + $0x78] sm:$0xff]   ;;  %v2281_v4 = vld [vmem:[#allocation9 + $0x70] sm:$0xff]   ;;  %v2493_v55 = vmov 0.0   ;;  %s2495_s2 = smov [#allocation11]  }
  0x35   :  { %v2278_v1 = vld [vmem:[#allocation9 + $0xf8] sm:$0xff]   ;;  %2127 = vmatprep.subr.bf16.mxu0 %v2277_v0  ;;  %v2282_v5 = vld [vmem:[#allocation9 + $0xf0] sm:$0xff]   ;;  %v2285_v8 = vld [vmem:[#allocation9 + $0x68] sm:$0xff]   ;;  %s1897_s3 = sshll.u32 %s2495_s2, 4  ;;  %s1898_s3 = int_to_ptr.vmem [resolvable:$true] %s1897_s3 }
  0x36   :  { %v2279_v2 = vld [vmem:[#allocation9 + $0x38] sm:$0xff]   ;;  %2149 = vmatprep.subr.bf16.mxu1 %v2278_v1  ;;  %v2283_v6 = vld [vmem:[#allocation9 + $0x30] sm:$0xff]   ;;  %v2286_v9 = vld [vmem:[#allocation9 + $0xe8] sm:$0xff]   ;;  %s2457_s11 = scalar_lea.vmem %s1898_s3, 128  ;;  %p2462_p7 = scmp.lt.s32.totalorder %s1898_s3, %s1898_s3 }
  0x37   :  { %v2280_v3 = vld [vmem:[#allocation9 + $0xb8] sm:$0xff]   ;;  %2128 = vmatpush3.bf16.msra.mxu0 %v2279_v2  ;;  %v2284_v7 = vld [vmem:[#allocation9 + $0xb0] sm:$0xff]   ;;  %v2287_v10 = vld [vmem:[#allocation9 + $0x28] sm:$0xff]   ;;  %p2458_p6 = scmp.ne.s32.totalorder %s1898_s3, %s2457_s11  ;;  %p2463_p8 = scmp.lt.s32.totalorder %s2457_s11, %s2457_s11 }
  0x38   :  { %2150 = vmatpush3.bf16.msra.mxu1 %v2280_v3  ;;  %2129 = vmatprep.subr.bf16.mxu0 %v2281_v4  ;;  %v2288_v11 = vld [vmem:[#allocation9 + $0xa8] sm:$0xff]   ;;  %v2289_v12 = vld [vmem:[#allocation9 + $0x60] sm:$0xff]   ;;  %v2293_v16 = vld [vmem:[#allocation9 + $0x58] sm:$0xff]  }
  0x39   :  { %2151 = vmatprep.subr.bf16.mxu1 %v2282_v5  ;;  %v2290_v13 = vld [vmem:[#allocation9 + $0xe0] sm:$0xff]   ;;  %v2294_v17 = vld [vmem:[#allocation9 + $0xd8] sm:$0xff]   ;;  %v2297_v20 = vld [vmem:[#allocation9 + $0x50] sm:$0xff]   ;;  %p2464_p9 = por %p2463_p8, %p2462_p7 }
  0x3a   :  { %v2291_v14 = vld [vmem:[#allocation9 + $0x20] sm:$0xff]   ;;  %v2295_v18 = vld [vmem:[#allocation9 + $0x18] sm:$0xff]   ;;  %v2298_v21 = vld [vmem:[#allocation9 + $0xd0] sm:$0xff]  }
  0x3b   :  { %2130 = vmatpush3.bf16.msra.mxu0 %v2283_v6  ;;  %v2292_v15 = vld [vmem:[#allocation9 + $0xa0] sm:$0xff]   ;;  %v2296_v19 = vld [vmem:[#allocation9 + $0x98] sm:$0xff]   ;;  %v2299_v22 = vld [vmem:[#allocation9 + $0x10] sm:$0xff]   ;;  %p2465_p10 = pnand %p2464_p9, %p2458_p6 }
  0x3c   :  { %2152 = vmatpush3.bf16.msra.mxu1 %v2284_v7  ;;  %2131 = vmatprep.subr.bf16.mxu0 %v2285_v8  ;;  %v2300_v23 = vld [vmem:[#allocation9 + $0x90] sm:$0xff]   ;;  %v2301_v24 = vld [vmem:[#allocation9 + $0x48] sm:$0xff]   ;;  %v2305_v28 = vld [vmem:[#allocation9 + $0x40] sm:$0xff]  }
  0x3d   :  { %2153 = vmatprep.subr.bf16.mxu1 %v2286_v9  ;;  %v2302_v25 = vld [vmem:[#allocation9 + $0xc8] sm:$0xff]   ;;  %v2306_v29 = vld [vmem:[#allocation9 + $0xc0] sm:$0xff]   ;;  %v2311_v40 = vld [vmem:[#allocation9 + $0x178] sm:$0xff]  }
  0x3e   :  { %v2303_v26 = vld [vmem:[#allocation9 + $0x8] sm:$0xff]   ;;  %v2307_v30 = vld [vmem:[#allocation9] sm:$0xff]   ;;  %v1939_v50 = vld [vmem:[#allocation8] ss:$0 sm:$0xff] }
  0x3f   :  { %2132 = vmatpush3.bf16.msra.mxu0 %v2287_v10  ;;  %v2304_v27 = vld [vmem:[#allocation9 + $0x88] sm:$0xff]   ;;  %v2308_v31 = vld [vmem:[#allocation9 + $0x80] sm:$0xff]   ;;  %v1940_v51 = vld [vmem:[#allocation8 + $0x1] ss:$0 sm:$0xff] }
  0x40   :  { %2154 = vmatpush3.bf16.msra.mxu1 %v2288_v11  ;;  %2133 = vmatprep.subr.bf16.mxu0 %v2289_v12  ;;  %v2533_v32 = vld [vmem:[#allocation3] sm:$0xff]  ;;  %v1908_v33 = vld [vmem:[#allocation6] ss:$0 sm:$0xff]  ;;  %v1909_v34 = vld [vmem:[#allocation6 + $0x1] ss:$0 sm:$0xff] }
  0x41   :  { %2155 = vmatprep.subr.bf16.mxu1 %v2290_v13  ;;  %v77_v35 = vmax.f32 %v2533_v32, 0.0  ;;  %v2537_v36 = vsub.f32 %v2533_v32, %v1908_v33  ;;  %v2540_v37 = vsub.f32 %v2533_v32, %v1909_v34  ;;  %v1910_v38 = vld [vmem:[#allocation6 + $0x2] ss:$0 sm:$0xff]  ;;  %v1911_v39 = vld [vmem:[#allocation6 + $0x3] ss:$0 sm:$0xff] }
  0x42   :  { %v2543_v41 = vsub.f32 %v2533_v32, %v1910_v38  ;;  %v2546_v42 = vsub.f32 %v2533_v32, %v1911_v39  ;;  %v1912_v43 = vld [vmem:[#allocation6 + $0x4] ss:$0 sm:$0xff]  ;;  %v1913_v44 = vld [vmem:[#allocation6 + $0x5] ss:$0 sm:$0xff]  ;;  %v1914_v45 = vld [vmem:[#allocation6 + $0x6] ss:$0 sm:$0xff] }
  0x43   :  { %2134 = vmatpush3.bf16.msra.mxu0 %v2291_v14  ;;  %v78_v46 = vpack.c.bf16 %v77_v35, %v77_v35  ;;  %v2549_v47 = vsub.f32 %v2533_v32, %v1912_v43  ;;  %v2552_v48 = vsub.f32 %v2533_v32, %v1913_v44  ;;  %v2555_v49 = vsub.f32 %v2533_v32, %v1914_v45  ;;  %v1941_v52 = vld [vmem:[#allocation8 + $0x2] ss:$0 sm:$0xff]  ;;  %v1942_v53 = vld [vmem:[#allocation8 + $0x3] ss:$0 sm:$0xff]  ;;  %v1943_v54 = vld [vmem:[#allocation8 + $0x4] ss:$0 sm:$0xff] }
  0x44   :  { %2156 = vmatpush3.bf16.msra.mxu1 %v2292_v15  ;;  %2135 = vmatprep.subr.bf16.mxu0 %v2293_v16  ;;  %vm176_vm0 = vcmp.ge.f32.partialorder %v2537_v36, 0.0  ;;  %vm177_vm1 = vcmp.lt.f32.partialorder %v2540_v37, 0.0  ;;  %vm181_vm2 = vcmp.ge.f32.partialorder %v2540_v37, 0.0  ;;  %vm182_vm3 = vcmp.lt.f32.partialorder %v2543_v41, 0.0  ;;  %v1944_v57 = vld [vmem:[#allocation8 + $0x5] ss:$0 sm:$0xff] }
  0x45   :  { %2157 = vmatprep.subr.bf16.mxu1 %v2294_v17  ;;  %79 = vst [vmem:[#allocation2] sm:$0xf] %v78_v46  ;;  %vm178_vm4 = vmand %vm176_vm0, %vm177_vm1  ;;  %vm186_vm5 = vcmp.ge.f32.partialorder %v2543_v41, 0.0  ;;  %vm187_vm6 = vcmp.lt.f32.partialorder %v2546_v42, 0.0  ;;  %vm191_vm7 = vcmp.ge.f32.partialorder %v2546_v42, 0.0  ;;  %vm192_vm8 = vcmp.lt.f32.partialorder %v2549_v47, 0.0 }
  0x46   :  { %v1924_v56 = vsel %vm178_vm4, 1.0, %v2493_v55  ;;  %vm183_vm9 = vmand %vm181_vm2, %vm182_vm3  ;;  %vm196_vm10 = vcmp.ge.f32.partialorder %v2549_v47, 0.0  ;;  %vm197_vm11 = vcmp.lt.f32.partialorder %v2552_v48, 0.0  ;;  %vm201_vm12 = vcmp.ge.f32.partialorder %v2552_v48, 0.0  ;;  %v1954_v9 = vld [vmem:[#allocation8 + $0xf] ss:$0 sm:$0xff] }
  0x47   :  { %2136 = vmatpush3.bf16.msra.mxu0 %v2295_v18  ;;  %v1925_v58 = vsel %vm183_vm9, 1.0, %v2493_v55  ;;  %vm188_vm13 = vmand %vm186_vm5, %vm187_vm6  ;;  %vm202_vm14 = vcmp.lt.f32.partialorder %v2555_v49, 0.0  ;;  %v256_v59 = vmul.f32 %v1939_v50, %v2537_v36  ;;  %v262_v60 = vmul.f32 %v1940_v51, %v2540_v37  ;;  %v1955_v10 = vld [vmem:[#allocation8 + $0x10] ss:$0 sm:$0xff]  ;;  %v1956_v15 = vld [vmem:[#allocation8 + $0x11] ss:$0 sm:$0xff] }
  0x48   :  { %2158 = vmatpush3.bf16.msra.mxu1 %v2296_v19  ;;  %2137 = vmatprep.subr.bf16.mxu0 %v2297_v20  ;;  %v1926_v61 = vsel %vm188_vm13, 1.0, %v2493_v55  ;;  %vm193_vm15 = vmand %vm191_vm7, %vm192_vm8  ;;  %v268_v62 = vmul.f32 %v1941_v52, %v2543_v41  ;;  %v274_v63 = vmul.f32 %v1942_v53, %v2546_v42  ;;  %v280_v0 = vmul.f32 %v1943_v54, %v2549_v47  ;;  %v1957_v20 = vld [vmem:[#allocation8 + $0x12] ss:$0 sm:$0xff]  ;;  %v1968_v35 = vld [vmem:[#allocation8 + $0x1d] ss:$0 sm:$0xff] }
  0x49   :  { %2159 = vmatprep.subr.bf16.mxu1 %v2298_v21  ;;  %v1927_v1 = vsel %vm193_vm15, 1.0, %v2493_v55  ;;  %vm198_vm0 = vmand %vm196_vm10, %vm197_vm11  ;;  %v2585_v2 = vmul.f32 %v1944_v57, %v2552_v48  ;;  %v341_v3 = vmul.f32 %v1924_v56, %v256_v59  ;;  %v342_v4 = vsub.f32 1.0, %v262_v60  ;;  %v1958_v21 = vld [vmem:[#allocation8 + $0x13] ss:$0 sm:$0xff]  ;;  %v1969_v38 = vld [vmem:[#allocation8 + $0x1e] ss:$0 sm:$0xff] }
  0x4a   :  { %v1928_v5 = vsel %vm198_vm0, 1.0, %v2493_v55  ;;  %vm203_vm1 = vmand %vm201_vm12, %vm202_vm14  ;;  %v345_v6 = vmul.f32 %v1925_v58, %v262_v60  ;;  %v346_v7 = vsub.f32 1.0, %v268_v62  ;;  %v349_v8 = vmul.f32 %v1926_v61, %v268_v62  ;;  %v1970_v45 = vld [vmem:[#allocation8 + $0x1f] ss:$0 sm:$0xff]  ;;  %v1971_v46 = vld [vmem:[#allocation8 + $0x20] ss:$0 sm:$0xff] }
  0x4b   :  { %2138 = vmatpush3.bf16.msra.mxu0 %v2299_v22  ;;  %v2591_v11 = vsel %vm203_vm1, 1.0, %v2493_v55  ;;  %v343_v12 = vmul.f32 %v1925_v58, %v342_v4  ;;  %v350_v13 = vsub.f32 1.0, %v274_v63  ;;  %v353_v14 = vmul.f32 %v1927_v1, %v274_v63  ;;  %v2312_v50 = vld [vmem:[#allocation9 + $0x1f8] sm:$0xff]   ;;  %v1981_v56 = vld [vmem:[#allocation8 + $0x2a] ss:$0 sm:$0xff] }
  0x4c   :  { %2160 = vmatpush3.bf16.msra.mxu1 %v2300_v23  ;;  %2139 = vmatprep.subr.bf16.mxu0 %v2301_v24  ;;  %v347_v16 = vmul.f32 %v1926_v61, %v346_v7  ;;  %v354_v17 = vsub.f32 1.0, %v280_v0  ;;  %v357_v18 = vmul.f32 %v1928_v5, %v280_v0  ;;  %v358_v19 = vsub.f32 1.0, %v2585_v2  ;;  %v1982_v61 = vld [vmem:[#allocation8 + $0x2b] ss:$0 sm:$0xff]  ;;  %v1983_v62 = vld [vmem:[#allocation8 + $0x2c] ss:$0 sm:$0xff] }
  0x4d   :  { %2161 = vmatprep.subr.bf16.mxu1 %v2302_v25  ;;  %v344_v22 = vadd.f32 %v343_v12, %v341_v3  ;;  %v351_v23 = vmul.f32 %v1927_v1, %v350_v13  ;;  %v402_v24 = vmul.f32 %v1954_v9, %v2537_v36  ;;  %v408_v25 = vmul.f32 %v1955_v10, %v2540_v37  ;;  %v1993_v4 = vld [vmem:[#allocation8 + $0x36] ss:$0 sm:$0xff]  ;;  %v1994_v9 = vld [vmem:[#allocation8 + $0x37] ss:$0 sm:$0xff] }
  0x4e   :  { %v2600_v33 = vmul.f32 %v1958_v21, %v2549_v47  ;;  %v538_v59 = vmul.f32 %v1968_v35, %v2537_v36  ;;  %v544_v60 = vmul.f32 %v1969_v38, %v2540_v37  ;;  %v550_v3 = vmul.f32 %v1970_v45, %v2543_v41  ;;  %v1915_v10 = vld [vmem:[#allocation6 + $0x7] ss:$0 sm:$0xff] }
  0x4f   :  { %2140 = vmatpush3.bf16.msra.mxu0 %v2303_v26  ;;  %v348_v26 = vadd.f32 %v347_v16, %v345_v6  ;;  %v481_v34 = vmul.f32 %v402_v24, %v344_v22  ;;  %v482_v43 = vsub.f32 1.0, %v408_v25  ;;  %v2610_v6 = vmul.f32 %v1971_v46, %v2546_v42  ;;  %v1916_v16 = vld [vmem:[#allocation6 + $0x8] ss:$0 sm:$0xff] }
  0x50   :  { %2162 = vmatpush3.bf16.msra.mxu1 %v2304_v27  ;;  %2141 = vmatprep.subr.bf16.mxu0 %v2305_v28  ;;  %v355_v27 = vmul.f32 %v1928_v5, %v354_v17  ;;  %v359_v28 = vmul.f32 %v2591_v11, %v358_v19  ;;  %v494_v54 = vsub.f32 1.0, %v2600_v33  ;;  %v612_v7 = vsub.f32 1.0, %v544_v60  ;;  %v1945_v17 = vld [vmem:[#allocation8 + $0x6] ss:$0 sm:$0xff] }
  0x51   :  { %2163 = vmatprep.subr.bf16.mxu1 %v2306_v29  ;;  %v414_v29 = vmul.f32 %v1956_v15, %v2543_v41  ;;  %v485_v44 = vmul.f32 %v408_v25, %v348_v26  ;;  %v483_v57 = vmul.f32 %v482_v43, %v348_v26  ;;  %v616_v15 = vsub.f32 1.0, %v550_v3  ;;  %v1960_v43 = vld [vmem:[#allocation8 + $0x15] ss:$0 sm:$0xff] }
  0x52   :  { %v356_v39 = vadd.f32 %v355_v27, %v353_v14  ;;  %v620_v19 = vsub.f32 1.0, %v2610_v6  ;;  %v2618_v21 = vmul.f32 %v1983_v62, %v2543_v41  ;;  %v2624_v35 = vmul.f32 %v1994_v9, %v2540_v37 }
  0x53   :  { %2142 = vmatpush3.bf16.msra.mxu0 %v2307_v30  ;;  %v352_v30 = vadd.f32 %v351_v23, %v349_v8  ;;  %v486_v51 = vsub.f32 1.0, %v414_v29  ;;  %v484_v5 = vadd.f32 %v483_v57, %v481_v34  ;;  %v664_v8 = vmul.f32 %v1981_v56, %v2537_v36 }
  0x54   :  { %2164 = vmatpush3.bf16.msra.mxu1 %v2308_v31  ;;  %2171 = vmatprep.subr.bf16.mxu0 %v2311_v40  ;;  %v420_v31 = vmul.f32 %v1957_v20, %v2546_v42  ;;  %v2602_v40 = vadd.f32 %v359_v28, %v357_v18  ;;  %v670_v20 = vmul.f32 %v1982_v61, %v2540_v37  ;;  %v736_v28 = vsub.f32 1.0, %v2618_v21 }
  0x55   :  { %v489_v52 = vmul.f32 %v414_v29, %v352_v30  ;;  %2193 = vmatprep.subr.bf16.mxu1 %v2312_v50  ;;  %v487_v63 = vmul.f32 %v486_v51, %v352_v30  ;;  %v611_v18 = vmul.f32 %v538_v59, %v484_v5  ;;  %v780_v29 = vmul.f32 %v1993_v4, %v2537_v36  ;;  %v1946_v30 = vld [vmem:[#allocation8 + $0x7] ss:$0 sm:$0xff]  ;;  %v1973_v59 = vld [vmem:[#allocation8 + $0x22] ss:$0 sm:$0xff] }
  0x56   :  { %v490_v53 = vsub.f32 1.0, %v420_v31  ;;  %v493_v58 = vmul.f32 %v420_v31, %v356_v39  ;;  %v495_v1 = vmul.f32 %v494_v54, %v2602_v40  ;;  %v732_v27 = vsub.f32 1.0, %v670_v20 }
  0x57   :  { %v488_v12 = vadd.f32 %v487_v63, %v485_v44  ;;  %v2627_v38 = vsub.f32 %v2533_v32, %v1915_v10  ;;  %v2630_v45 = vsub.f32 %v2533_v32, %v1916_v16  ;;  %vm206_vm2 = vcmp.ge.f32.partialorder %v2555_v49, 0.0 }
  0x58   :  { %v491_v0 = vmul.f32 %v490_v53, %v356_v39  ;;  %v2613_v14 = vadd.f32 %v495_v1, %v493_v58  ;;  %v1959_v39 = vld [vmem:[#allocation8 + $0x14] ss:$0 sm:$0xff]  ;;  %v292_v46 = vmul.f32 %v1945_v17, %v2555_v49  ;;  %v1972_v53 = vld [vmem:[#allocation8 + $0x21] ss:$0 sm:$0xff]  ;;  %v361_v57 = vmul.f32 %v2591_v11, %v2585_v2 }
  0x59   :  { %v613_v22 = vmul.f32 %v612_v7, %v488_v12  ;;  %v615_v23 = vmul.f32 %v544_v60, %v488_v12  ;;  %vm207_vm3 = vcmp.lt.f32.partialorder %v2627_v38, 0.0  ;;  %vm211_vm4 = vcmp.ge.f32.partialorder %v2627_v38, 0.0 }
  0x5a   :  { %v492_v13 = vadd.f32 %v491_v0, %v489_v52  ;;  %v621_v26 = vmul.f32 %v620_v19, %v2613_v14  ;;  %v842_v52 = vsub.f32 1.0, %v2624_v35  ;;  %vm212_vm5 = vcmp.lt.f32.partialorder %v2630_v45, 0.0  ;;  %vm208_vm6 = vmand %vm206_vm2, %vm207_vm3  ;;  %v1984_v0 = vld [vmem:[#allocation8 + $0x2d] ss:$0 sm:$0xff] }
  0x5b   :  { %v614_v31 = vadd.f32 %v613_v22, %v611_v18  ;;  %v2639_v56 = vmul.f32 %v1946_v30, %v2627_v38  ;;  %v362_v58 = vsub.f32 1.0, %v292_v46  ;;  %v1930_v61 = vsel %vm208_vm6, 1.0, %v2493_v55  ;;  %vm213_vm7 = vmand %vm211_vm4, %vm212_vm5 }
  0x5c   :  { %v617_v24 = vmul.f32 %v616_v15, %v492_v13  ;;  %v619_v25 = vmul.f32 %v550_v3, %v492_v13  ;;  %v432_v62 = vmul.f32 %v1959_v39, %v2552_v48  ;;  %v2646_v63 = vmul.f32 %v1960_v43, %v2555_v49  ;;  %v1985_v13 = vld [vmem:[#allocation8 + $0x2e] ss:$0 sm:$0xff] }
  0x5d   :  { %v731_v36 = vmul.f32 %v664_v8, %v614_v31  ;;  %v1931_v3 = vsel %vm213_vm7, 1.0, %v2493_v55  ;;  %v363_v4 = vmul.f32 %v1930_v61, %v362_v58  ;;  %v365_v7 = vmul.f32 %v1930_v61, %v292_v46 }
  0x5e   :  { %v618_v34 = vadd.f32 %v617_v24, %v615_v23  ;;  %v622_v44 = vadd.f32 %v621_v26, %v619_v25  ;;  %v366_v2 = vsub.f32 1.0, %v2639_v56  ;;  %v497_v11 = vmul.f32 %v2600_v33, %v2602_v40  ;;  %v1995_v25 = vld [vmem:[#allocation8 + $0x38] ss:$0 sm:$0xff]  ;;  %v1996_v26 = vld [vmem:[#allocation8 + $0x39] ss:$0 sm:$0xff] }
  0x5f   :  { %v364_v8 = vadd.f32 %v363_v4, %v361_v57  ;;  %v498_v9 = vsub.f32 1.0, %v432_v62  ;;  %v502_v10 = vsub.f32 1.0, %v2646_v63  ;;  %v562_v12 = vmul.f32 %v1972_v53, %v2549_v47  ;;  %v2315_v4 = vld [vmem:[#allocation9 + $0x170] sm:$0xff]  }
  0x60   :  { %v733_v50 = vmul.f32 %v732_v27, %v618_v34  ;;  %v735_v51 = vmul.f32 %v670_v20, %v618_v34  ;;  %v737_v37 = vmul.f32 %v736_v28, %v622_v44  ;;  %v367_v16 = vmul.f32 %v1931_v3, %v366_v2  ;;  %v2319_v2 = vld [vmem:[#allocation9 + $0x168] sm:$0xff]  }
  0x61   :  { %v568_v17 = vmul.f32 %v1973_v59, %v2552_v48  ;;  %v499_v18 = vmul.f32 %v498_v9, %v364_v8  ;;  %v624_v19 = vsub.f32 1.0, %v562_v12  ;;  %v682_v20 = vmul.f32 %v1984_v0, %v2546_v42  ;;  %v2313_v0 = vld [vmem:[#allocation9 + $0x138] sm:$0xff]  }
  0x62   :  { %v734_v54 = vadd.f32 %v733_v50, %v731_v36  ;;  %v738_v60 = vadd.f32 %v737_v37, %v735_v51  ;;  %v368_v23 = vadd.f32 %v367_v16, %v365_v7  ;;  %v501_v24 = vmul.f32 %v432_v62, %v364_v8  ;;  %v1947_v8 = vld [vmem:[#allocation8 + $0x8] ss:$0 sm:$0xff] }
  0x63   :  { %v500_v33 = vadd.f32 %v499_v18, %v497_v11  ;;  %v623_v40 = vmul.f32 %v2610_v6, %v2613_v14  ;;  %v628_v28 = vsub.f32 1.0, %v568_v17  ;;  %v740_v31 = vsub.f32 1.0, %v682_v20  ;;  %v1918_v11 = vld [vmem:[#allocation6 + $0xa] ss:$0 sm:$0xff]  ;;  %v1948_v18 = vld [vmem:[#allocation8 + $0x9] ss:$0 sm:$0xff] }
  0x64   :  { %v841_v1 = vmul.f32 %v780_v29, %v734_v54  ;;  %v843_v5 = vmul.f32 %v842_v52, %v738_v60  ;;  %v503_v27 = vmul.f32 %v502_v10, %v368_v23  ;;  %v688_v29 = vmul.f32 %v1985_v13, %v2549_v47 }
  0x65   :  { %v625_v30 = vmul.f32 %v624_v19, %v500_v33  ;;  %v792_v34 = vmul.f32 %v1995_v25, %v2543_v41  ;;  %v627_v43 = vmul.f32 %v562_v12, %v500_v33  ;;  %v739_v36 = vmul.f32 %v2618_v21, %v622_v44  ;;  %v1986_v25 = vld [vmem:[#allocation8 + $0x2f] ss:$0 sm:$0xff] }
  0x66   :  { %v844_v15 = vadd.f32 %v843_v5, %v841_v1  ;;  %v504_v39 = vadd.f32 %v503_v27, %v501_v24  ;;  %v744_v51 = vsub.f32 1.0, %v688_v29  ;;  %v798_v52 = vmul.f32 %v1996_v26, %v2546_v42  ;;  %v2317_v42 = vld [vmem:[#allocation9 + $0x130] sm:$0xff]   ;;  %v2321_v24 = vld [vmem:[#allocation9 + $0x128] sm:$0xff]   ;;  %v2323_v33 = vld [vmem:[#allocation9 + $0x160] sm:$0xff]  }
  0x67   :  { %v626_v46 = vadd.f32 %v625_v30, %v623_v40  ;;  %v846_v14 = vsub.f32 1.0, %v792_v34  ;;  %v845_v58 = vmul.f32 %v2624_v35, %v738_v60  ;;  %vm216_vm8 = vcmp.ge.f32.partialorder %v2630_v45, 0.0  ;;  %v1917_v60 = vld [vmem:[#allocation6 + $0x9] ss:$0 sm:$0xff] }
  0x68   :  { %v881_v22 = vpack.c.bf16 %v844_v15, %v844_v15  ;;  %v629_v50 = vmul.f32 %v628_v28, %v504_v39  ;;  %v850_v62 = vsub.f32 1.0, %v798_v52  ;;  %v369_v35 = vmul.f32 %v1931_v3, %v2639_v56  ;;  %v1961_v56 = vld [vmem:[#allocation8 + $0x16] ss:$0 sm:$0xff]  ;;  %v1962_v3 = vld [vmem:[#allocation8 + $0x17] ss:$0 sm:$0xff] }
  0x69   :  { %v741_v6 = vmul.f32 %v740_v31, %v626_v46  ;;  %v743_v53 = vmul.f32 %v682_v20, %v626_v46  ;;  %v2666_v9 = vmul.f32 %v2646_v63, %v368_v23  ;;  %v2668_v10 = vmul.f32 %v568_v17, %v504_v39  ;;  %v1974_v63 = vld [vmem:[#allocation8 + $0x23] ss:$0 sm:$0xff]  ;;  %v1975_v17 = vld [vmem:[#allocation8 + $0x24] ss:$0 sm:$0xff]  ;;  %v1997_v46 = vld [vmem:[#allocation8 + $0x3a] ss:$0 sm:$0xff] }
  0x6a   :  { %882 = vst [vmem:[#allocation2 + $0x4] sm:$0xf] %v881_v22  ;;  %v630_v37 = vadd.f32 %v629_v50, %v627_v43  ;;  %v2671_v13 = vsub.f32 %v2533_v32, %v1917_v60  ;;  %v2674_v15 = vsub.f32 %v2533_v32, %v1918_v11  ;;  %v304_v16 = vmul.f32 %v1947_v8, %v2630_v45 }
  0x6b   :  { %v742_v57 = vadd.f32 %v741_v6, %v739_v36  ;;  %v444_v19 = vmul.f32 %v1961_v56, %v2627_v38  ;;  %v2679_v20 = vmul.f32 %v1962_v3, %v2630_v45  ;;  %v2696_v43 = vmul.f32 %v1974_v63, %v2555_v49  ;;  %v2316_v36 = vld [vmem:[#allocation9 + $0x1f0] sm:$0xff]  }
  0x6c   :  { %v745_v41 = vmul.f32 %v744_v51, %v630_v37  ;;  %v2681_v22 = vmul.f32 %v688_v29, %v630_v37  ;;  %vm217_vm9 = vcmp.lt.f32.partialorder %v2671_v13, 0.0  ;;  %vm221_vm10 = vcmp.ge.f32.partialorder %v2671_v13, 0.0  ;;  %v1987_v29 = vld [vmem:[#allocation8 + $0x30] ss:$0 sm:$0xff]  ;;  %v2325_v37 = vld [vmem:[#allocation9 + $0x120] sm:$0xff]   ;;  %v2331_v56 = vld [vmem:[#allocation9 + $0x150] sm:$0xff]  }
  0x6d   :  { %v847_v1 = vmul.f32 %v846_v14, %v742_v57  ;;  %v849_v44 = vmul.f32 %v792_v34, %v742_v57  ;;  %vm222_vm11 = vcmp.lt.f32.partialorder %v2674_v15, 0.0  ;;  %vm218_vm12 = vmand %vm216_vm8, %vm217_vm9  ;;  %v310_v40 = vmul.f32 %v1948_v18, %v2671_v13  ;;  %v2314_v34 = vld [vmem:[#allocation9 + $0x1b8] sm:$0xff]   ;;  %v1998_v14 = vld [vmem:[#allocation8 + $0x3b] ss:$0 sm:$0xff] }
  0x6e   :  { %v746_v21 = vadd.f32 %v745_v41, %v743_v53  ;;  %v370_v26 = vsub.f32 1.0, %v304_v16  ;;  %v506_v27 = vsub.f32 1.0, %v444_v19  ;;  %v510_v28 = vsub.f32 1.0, %v2679_v20  ;;  %vm223_vm13 = vmand %vm221_vm10, %vm222_vm11  ;;  %v2329_v18 = vld [vmem:[#allocation9 + $0x118] sm:$0xff]  }
  0x6f   :  { %v848_v5 = vadd.f32 %v847_v1, %v845_v58  ;;  %v1932_v39 = vsel %vm218_vm12, 1.0, %v2493_v55  ;;  %v1933_v50 = vsel %vm223_vm13, 1.0, %v2493_v55  ;;  %v374_v6 = vsub.f32 1.0, %v310_v40  ;;  %v1920_v1 = vld [vmem:[#allocation6 + $0xc] ss:$0 sm:$0xff] }
  0x70   :  { %v851_v7 = vmul.f32 %v850_v62, %v746_v21  ;;  %v2683_v23 = vmul.f32 %v798_v52, %v746_v21  ;;  %v371_v51 = vmul.f32 %v1932_v39, %v370_v26  ;;  %v373_v52 = vmul.f32 %v1932_v39, %v304_v16  ;;  %v2318_v21 = vld [vmem:[#allocation9 + $0x1b0] sm:$0xff]   ;;  %v2322_v16 = vld [vmem:[#allocation9 + $0x1a8] sm:$0xff]   ;;  %v2326_v39 = vld [vmem:[#allocation9 + $0x1a0] sm:$0xff]  }
  0x71   :  { %v901_v54 = vld [vmem:[#allocation2] sm:$0xff]  ;;  %v2369_v30 = vpack.c.bf16 %v848_v5, %v848_v5  ;;  %v2700_v53 = vmul.f32 %v1975_v17, %v2627_v38  ;;  %v2704_v57 = vmul.f32 %v1986_v25, %v2552_v48  ;;  %v2707_v58 = vmul.f32 %v1987_v29, %v2555_v49  ;;  %v2324_v25 = vld [vmem:[#allocation9 + $0x1e0] sm:$0xff]  }
  0x72   :  { %v2004_v59 = vcombine.low %v901_v54, %v901_v54  ;;  %v2005_v61 = vcombine.high %v901_v54, %v901_v54  ;;  %v852_v12 = vadd.f32 %v851_v7, %v849_v44  ;;  %v632_v54 = vsub.f32 1.0, %v2696_v43  ;;  %v2333_v29 = vld [vmem:[#allocation9 + $0x110] sm:$0xff]  }
  0x73   :  { %v372_v41 = vadd.f32 %v371_v51, %v369_v35  ;;  %v375_v62 = vmul.f32 %v1933_v50, %v374_v6  ;;  %vm226_vm14 = vcmp.ge.f32.partialorder %v2674_v15, 0.0  ;;  %v636_v44 = vsub.f32 1.0, %v2700_v53  ;;  %v2320_v35 = vld [vmem:[#allocation9 + $0x1e8] sm:$0xff]  }
  0x74   :  { %1682 = vmatprep.mubr.bf16.mxu0 %v2005_v61  ;;  %v2370_v31 = vpack.c.bf16 %v852_v12, %v852_v12  ;;  %v2327_v61 = vld [vmem:[#allocation9 + $0x158] sm:$0xff]   ;;  %v752_v5 = vsub.f32 1.0, %v2707_v58  ;;  %v2717_v7 = vmul.f32 %v1998_v14, %v2552_v48  ;;  %v1950_v12 = vld [vmem:[#allocation8 + $0xb] ss:$0 sm:$0xff]  ;;  %v2725_v48 = vsub.f32 %v2533_v32, %v1920_v1 }
  0x75   :  { %1683 = vmatmul.mubr.bf16.vlgmr.msra.gmra.mxu0 %v2004_v59  ;;  %v1919_v59 = vld [vmem:[#allocation6 + $0xb] ss:$0 sm:$0xff]  ;;  %v507_v60 = vmul.f32 %v506_v27, %v372_v41  ;;  %v509_v11 = vmul.f32 %v444_v19, %v372_v41  ;;  %v377_v26 = vmul.f32 %v1933_v50, %v310_v40  ;;  %vm2494_vm10 = vmmov 0  }
  0x76   :  { %2172 = vmatpush3.bf16.msra.mxu0 %v2313_v0  ;;  %1722 = vmatprep.mubr.bf16.mxu1 %v2370_v31  ;;  %v2710_v0 = vmul.f32 %v1997_v46, %v2549_v47  ;;  %v376_v47 = vadd.f32 %v375_v62, %v373_v52  ;;  %v858_v3 = vsub.f32 1.0, %v2717_v7  ;;  %v2722_v63 = vsub.f32 %v2533_v32, %v1919_v59  ;;  %v2328_v52 = vld [vmem:[#allocation9 + $0x1d8] sm:$0xff]   ;;  %v1988_v59 = vld [vmem:[#allocation8 + $0x31] ss:$0 sm:$0xff] }
  0x77   :  { %2173 = vmatprep.subr.bf16.mxu0 %v2315_v4  ;;  %1723 = vmatmul.mubr.bf16.vlgmr.msra.gmra.mxu1 %v2369_v30  ;;  %v1949_v4 = vld [vmem:[#allocation8 + $0xa] ss:$0 sm:$0xff]  ;;  %v508_v19 = vadd.f32 %v507_v60, %v2666_v9  ;;  %vm232_vm1 = vcmp.lt.f32.partialorder %v2725_v48, 0.0  ;;  %vm236_vm4 = vcmp.ge.f32.partialorder %v2725_v48, 0.0 }
  0x78   :  { %2194 = vmatpush3.bf16.msra.mxu1 %v2314_v34  ;;  %v854_v8 = vsub.f32 1.0, %v2710_v0  ;;  %v316_v17 = vmul.f32 %v1949_v4, %v2674_v15  ;;  %vm227_vm15 = vcmp.lt.f32.partialorder %v2722_v63, 0.0  ;;  %vm231_vm0 = vcmp.ge.f32.partialorder %v2722_v63, 0.0  ;;  %v1977_v34 = vld [vmem:[#allocation8 + $0x26] ss:$0 sm:$0xff] }
  0x79   :  { %2195 = vmatprep.subr.bf16.mxu1 %v2316_v36  ;;  %v2734_v32 = vmul.f32 %v1950_v12, %v2722_v63  ;;  %v633_v31 = vmul.f32 %v632_v54, %v508_v19  ;;  %v635_v9 = vmul.f32 %v2696_v43, %v508_v19  ;;  %vm228_vm2 = vmand %vm226_vm14, %vm227_vm15  ;;  %v513_v51 = vmul.f32 %v2679_v20, %v376_v47  ;;  %v2335_v43 = vld [vmem:[#allocation9 + $0x148] sm:$0xff]   ;;  %v2339_v20 = vld [vmem:[#allocation9 + $0x140] sm:$0xff]  }
  0x7a   :  { %2174 = vmatpush3.bf16.msra.mxu0 %v2317_v42  ;;  %v748_v42 = vsub.f32 1.0, %v2704_v57  ;;  %v378_v40 = vsub.f32 1.0, %v316_v17  ;;  %v1934_v46 = vsel %vm228_vm2, 1.0, %v2493_v55  ;;  %vm233_vm3 = vmand %vm231_vm0, %vm232_vm1  ;;  %v2758_v12 = vmul.f32 %v1977_v34, %v2671_v13 }
  0x7b   :  { %2175 = vmatprep.subr.bf16.mxu0 %v2319_v2  ;;  %v1963_v2 = vld [vmem:[#allocation8 + $0x18] ss:$0 sm:$0xff]  ;;  %v382_v36 = vsub.f32 1.0, %v2734_v32  ;;  %v634_v6 = vadd.f32 %v633_v31, %v2668_v10  ;;  %v381_v41 = vmul.f32 %v1934_v46, %v316_v17 }
  0x7c   :  { %v456_v27 = vmul.f32 %v1963_v2, %v2671_v13  ;;  %2196 = vmatpush3.bf16.msra.mxu1 %v2318_v21  ;;  %v379_v54 = vmul.f32 %v1934_v46, %v378_v40  ;;  %v2343_v46 = vld [vmem:[#allocation9 + $0x278] sm:$0xff]  }
  0x7d   :  { %2197 = vmatprep.subr.bf16.mxu1 %v2320_v35  ;;  %v749_v10 = vmul.f32 %v748_v42, %v634_v6  ;;  %v1989_v35 = vld [vmem:[#allocation8 + $0x32] ss:$0 sm:$0xff] }
  0x7e   :  { %2176 = vmatpush3.bf16.msra.mxu0 %v2321_v24  ;;  %v1964_v24 = vld [vmem:[#allocation8 + $0x19] ss:$0 sm:$0xff]  ;;  %v514_v1 = vsub.f32 1.0, %v456_v27  ;;  %v380_v2 = vadd.f32 %v379_v54, %v377_v26  ;;  %v706_v26 = vmul.f32 %v1988_v59, %v2627_v38  ;;  %v2338_v54 = vld [vmem:[#allocation9 + $0x188] sm:$0xff]  }
  0x7f   :  { %2177 = vmatprep.subr.bf16.mxu0 %v2323_v33  ;;  %v511_v33 = vmul.f32 %v510_v28, %v376_v47  ;;  %v1976_v28 = vld [vmem:[#allocation8 + $0x25] ss:$0 sm:$0xff]  ;;  %v2742_v50 = vmul.f32 %v1964_v24, %v2674_v15  ;;  %v1999_v24 = vld [vmem:[#allocation8 + $0x3c] ss:$0 sm:$0xff] }
  0x80   :  { %2198 = vmatpush3.bf16.msra.mxu1 %v2322_v16  ;;  %v2330_v47 = vld [vmem:[#allocation9 + $0x198] sm:$0xff]   ;;  %v515_v42 = vmul.f32 %v514_v1, %v380_v2  ;;  %v517_v17 = vmul.f32 %v456_v27, %v380_v2  ;;  %v2341_v27 = vld [vmem:[#allocation9 + $0x100] sm:$0xff]   ;;  %v756_v40 = vsub.f32 1.0, %v706_v26  ;;  %v2346_v2 = vld [vmem:[#allocation9 + $0x270] sm:$0xff]  }
  0x81   :  { %v512_v30 = vadd.f32 %v511_v33, %v509_v11  ;;  %v518_v4 = vsub.f32 1.0, %v2742_v50  ;;  %2199 = vmatprep.subr.bf16.mxu1 %v2324_v25  ;;  %v586_v11 = vmul.f32 %v1976_v28, %v2630_v45  ;;  %v644_v33 = vsub.f32 1.0, %v2758_v12  ;;  %v2340_v1 = vld [vmem:[#allocation9 + $0x1c0] sm:$0xff]  }
  0x82   :  { %2178 = vmatpush3.bf16.msra.mxu0 %v2325_v37  ;;  %v2747_v37 = vsel %vm233_vm3, 1.0, %v2493_v55 }
  0x83   :  { %2179 = vmatprep.subr.bf16.mxu0 %v2327_v61  ;;  %v637_v14 = vmul.f32 %v636_v44, %v512_v30  ;;  %v2337_v61 = vld [vmem:[#allocation9 + $0x108] sm:$0xff]   ;;  %v383_v62 = vmul.f32 %v2747_v37, %v382_v36  ;;  %v751_v44 = vmul.f32 %v2704_v57, %v634_v6  ;;  %v639_v16 = vmul.f32 %v2700_v53, %v512_v30 }
  0x84   :  { %2200 = vmatpush3.bf16.msra.mxu1 %v2326_v39  ;;  %v640_v19 = vsub.f32 1.0, %v586_v11  ;;  %v516_v30 = vadd.f32 %v515_v42, %v513_v51  ;;  %v2336_v6 = vld [vmem:[#allocation9 + $0x1c8] sm:$0xff]  }
  0x85   :  { %v638_v21 = vadd.f32 %v637_v14, %v635_v9  ;;  %v2754_v60 = vadd.f32 %v383_v62, %v381_v41  ;;  %2201 = vmatprep.subr.bf16.mxu1 %v2328_v52  ;;  %v2773_v9 = vmul.f32 %v1989_v35, %v2630_v45  ;;  %v816_v52 = vmul.f32 %v1999_v24, %v2555_v49  ;;  %v2349_v42 = vld [vmem:[#allocation9 + $0x268] sm:$0xff]   ;;  %v2794_v24 = vld [vmem:[#allocation3] sm:$0xff] }
  0x86   :  { %2180 = vmatpush3.bf16.msra.mxu0 %v2329_v18  ;;  %v2332_v18 = vld [vmem:[#allocation9 + $0x1d0] sm:$0xff]   ;;  %v641_v39 = vmul.f32 %v640_v19, %v516_v30 }
  0x87   :  { %2181 = vmatprep.subr.bf16.mxu0 %v2331_v56  ;;  %v750_v56 = vadd.f32 %v749_v10, %v2681_v22  ;;  %v753_v57 = vmul.f32 %v752_v5, %v638_v21  ;;  %v519_v25 = vmul.f32 %v518_v4, %v2754_v60  ;;  %v2000_v5 = vld [vmem:[#allocation8 + $0x3d] ss:$0 sm:$0xff]  ;;  %v760_v51 = vsub.f32 1.0, %v2773_v9 }
  0x88   :  { %2202 = vmatpush3.bf16.msra.mxu1 %v2330_v47  ;;  %v642_v14 = vadd.f32 %v641_v39, %v639_v16 }
  0x89   :  { %v754_v53 = vadd.f32 %v753_v57, %v751_v44  ;;  %v857_v22 = vmul.f32 %v2710_v0, %v750_v56  ;;  %v2770_v31 = vadd.f32 %v519_v25, %v517_v17  ;;  %v2334_v0 = vld [vmem:[#allocation9 + $0x190] sm:$0xff]   ;;  %2203 = vmatprep.subr.bf16.mxu1 %v2332_v18 }
  0x8a   :  { %2182 = vmatpush3.bf16.msra.mxu0 %v2333_v29  ;;  %v855_v29 = vmul.f32 %v854_v8, %v750_v56  ;;  %v643_v8 = vmul.f32 %v586_v11, %v516_v30  ;;  %v757_v41 = vmul.f32 %v756_v40, %v642_v14  ;;  %v759_v62 = vmul.f32 %v706_v26, %v642_v14  ;;  %v2342_v11 = vld [vmem:[#allocation9 + $0x180] sm:$0xff]   ;;  %v2347_v56 = vld [vmem:[#allocation9 + $0x230] sm:$0xff]   ;;  %v2345_v40 = vld [vmem:[#allocation9 + $0x2b8] sm:$0xff]  }
  0x8b   :  { %2183 = vmatprep.subr.bf16.mxu0 %v2335_v43  ;;  %v859_v34 = vmul.f32 %v858_v3, %v754_v53  ;;  %v645_v36 = vmul.f32 %v644_v33, %v2770_v31  ;;  %v2782_v43 = vmul.f32 %v2000_v5, %v2627_v38  ;;  %v755_v3 = vmul.f32 %v2707_v58, %v638_v21  ;;  %v2344_v21 = vld [vmem:[#allocation9 + $0x238] sm:$0xff]   ;;  %v1922_v17 = vld [vmem:[#allocation6 + $0xe] ss:$0 sm:$0xff]  ;;  %v1951_v33 = vld [vmem:[#allocation8 + $0xc] ss:$0 sm:$0xff] }
  0x8c   :  { %v856_v28 = vadd.f32 %v855_v29, %v2683_v23  ;;  %2204 = vmatpush3.bf16.msra.mxu1 %v2334_v0  ;;  %v861_v58 = vmul.f32 %v2717_v7, %v754_v53  ;;  %v1921_v7 = vld [vmem:[#allocation6 + $0xd] ss:$0 sm:$0xff]  ;;  %v2800_v19 = vsub.f32 %v2794_v24, %v1922_v17  ;;  %v1952_v26 = vld [vmem:[#allocation8 + $0xd] ss:$0 sm:$0xff]  ;;  %v1965_v53 = vld [vmem:[#allocation8 + $0x1a] ss:$0 sm:$0xff]  ;;  %v328_v29 = vmul.f32 %v1951_v33, %v2725_v48 }
  0x8d   :  { %v860_v23 = vadd.f32 %v859_v34, %v857_v22  ;;  %v2785_v59 = vadd.f32 %v645_v36, %v643_v8  ;;  %v866_v38 = vsub.f32 1.0, %v2782_v43  ;;  %2205 = vmatprep.subr.bf16.mxu1 %v2336_v6  ;;  %v758_v10 = vadd.f32 %v757_v41, %v755_v3  ;;  %v1966_v5 = vld [vmem:[#allocation8 + $0x1b] ss:$0 sm:$0xff]  ;;  %v1979_v0 = vld [vmem:[#allocation8 + $0x28] ss:$0 sm:$0xff] }
  0x8e   :  { %2184 = vmatpush3.bf16.msra.mxu0 %v2337_v61  ;;  %v862_v61 = vsub.f32 1.0, %v816_v52  ;;  %v2371_v4 = vpack.c.bf16 %v856_v28, %v856_v28  ;;  %v2797_v25 = vsub.f32 %v2794_v24, %v1921_v7  ;;  %v385_v22 = vmul.f32 %v2747_v37, %v2734_v32  ;;  %v2350_v28 = vld [vmem:[#allocation9 + $0x228] sm:$0xff]   ;;  %v2352_v37 = vld [vmem:[#allocation9 + $0x260] sm:$0xff]   ;;  %v2358_v17 = vld [vmem:[#allocation9 + $0x250] sm:$0xff]  }
  0x8f   :  { %2185 = vmatprep.subr.bf16.mxu0 %v2339_v20  ;;  %v761_v49 = vmul.f32 %v760_v51, %v2785_v59  ;;  %v2372_v20 = vpack.c.bf16 %v860_v23, %v860_v23  ;;  %v865_v47 = vmul.f32 %v816_v52, %v758_v10  ;;  %v468_v30 = vmul.f32 %v1965_v53, %v2722_v63  ;;  %v2351_v7 = vld [vmem:[#allocation9 + $0x2a8] sm:$0xff]  }
  0x90   :  { %v863_v35 = vmul.f32 %v862_v61, %v758_v10  ;;  %2206 = vmatpush3.bf16.msra.mxu1 %v2338_v54  ;;  %vm237_vm5 = vcmp.lt.f32.partialorder %v2797_v25, 0.0  ;;  %vm241_vm6 = vcmp.ge.f32.partialorder %v2797_v25, 0.0  ;;  %vm242_vm7 = vcmp.lt.f32.partialorder %v2800_v19, 0.0  ;;  %v2348_v54 = vld [vmem:[#allocation9 + $0x2b0] sm:$0xff]   ;;  %v2353_v61 = vld [vmem:[#allocation9 + $0x220] sm:$0xff]  }
  0x91   :  { %v2790_v44 = vadd.f32 %v761_v49, %v759_v62  ;;  %1762 = vmatprep.mubr.bf16.mxu0 %v2372_v20  ;;  %2207 = vmatprep.subr.bf16.mxu1 %v2340_v1  ;;  %v2811_v34 = vmul.f32 %v1952_v26, %v2797_v25  ;;  %vm238_vm8 = vmand %vm236_vm4, %vm237_vm5  ;;  %v386_v8 = vsub.f32 1.0, %v328_v29  ;;  %v522_v3 = vsub.f32 1.0, %v468_v30  ;;  %v1991_v49 = vld [vmem:[#allocation8 + $0x34] ss:$0 sm:$0xff]  ;;  %v1923_v10 = vld [vmem:[#allocation6 + $0xf] ss:$0 sm:$0xff] }
  0x92   :  { %2186 = vmatpush3.bf16.msra.mxu0 %v2341_v27  ;;  %v864_v18 = vadd.f32 %v863_v35, %v861_v58  ;;  %v1978_v27 = vld [vmem:[#allocation8 + $0x27] ss:$0 sm:$0xff]  ;;  %v1936_v36 = vsel %vm238_vm8, 1.0, %v2493_v55  ;;  %vm243_vm9 = vmand %vm241_vm6, %vm242_vm7  ;;  %v2824_v1 = vmul.f32 %v1979_v0, %v2722_v63  ;;  %v521_v20 = vmul.f32 %v2742_v50, %v2754_v60  ;;  %v1953_v58 = vld [vmem:[#allocation8 + $0xe] ss:$0 sm:$0xff] }
  0x93   :  { %2215 = vmatprep.subr.bf16.mxu0 %v2343_v46  ;;  %v867_v16 = vmul.f32 %v866_v38, %v2790_v44  ;;  %v2816_v46 = vmul.f32 %v1966_v5, %v2725_v48  ;;  %v390_v51 = vsub.f32 1.0, %v2811_v34  ;;  %v598_v52 = vmul.f32 %v1978_v27, %v2674_v15  ;;  %v2355_v38 = vld [vmem:[#allocation9 + $0x258] sm:$0xff]   ;;  %v2001_v50 = vld [vmem:[#allocation8 + $0x3e] ss:$0 sm:$0xff]  ;;  %v1980_v5 = vld [vmem:[#allocation8 + $0x29] ss:$0 sm:$0xff] }
  0x94   :  { %2208 = vmatpush3.bf16.msra.mxu1 %v2342_v11  ;;  %v2373_v39 = vpack.c.bf16 %v864_v18, %v864_v18  ;;  %v1937_v6 = vsel %vm243_vm9, 1.0, %v2493_v55  ;;  %v387_v23 = vmul.f32 %v1936_v36, %v386_v8  ;;  %v389_v14 = vmul.f32 %v1936_v36, %v328_v29  ;;  %v1967_v11 = vld [vmem:[#allocation8 + $0x1c] ss:$0 sm:$0xff]  ;;  %v2356_v60 = vld [vmem:[#allocation9 + $0x218] sm:$0xff]   ;;  %v2354_v0 = vld [vmem:[#allocation9 + $0x2a0] sm:$0xff]  }
  0x95   :  { %1763 = vmatmul.mubr.bf16.vlgmr.msra.gmra.mxu0 %v2371_v4  ;;  %v868_v57 = vadd.f32 %v867_v16, %v865_v47  ;;  %2246 = vmatprep.subr.bf16.mxu1 %v2493_v55  ;;  %v391_v41 = vmul.f32 %v1937_v6, %v390_v51  ;;  %v526_v62 = vsub.f32 1.0, %v2816_v46  ;;  %v648_v35 = vsub.f32 1.0, %v598_v52  ;;  %v1990_v47 = vld [vmem:[#allocation8 + $0x33] ss:$0 sm:$0xff] }
  0x96   :  { %2216 = vmatpush3.bf16.msra.mxu0 %v2344_v21  ;;  %v388_v4 = vadd.f32 %v387_v23, %v385_v22  ;;  %vm246_vm11 = vcmp.ge.f32.partialorder %v2800_v19, 0.0  ;;  %v718_v26 = vmul.f32 %v1990_v47, %v2671_v13  ;;  %v480_v53 = vmul.f32 %v1967_v11, %v2797_v25  ;;  %v2361_v36 = vld [vmem:[#allocation9 + $0x248] sm:$0xff]  }
  0x97   :  { %2217 = vmatprep.subr.bf16.mxu0 %v2346_v2  ;;  %v2374_v32 = vpack.c.bf16 %v868_v57, %v868_v57  ;;  %v392_v21 = vadd.f32 %v391_v41, %v389_v14  ;;  %v647_v2 = vmul.f32 %v2758_v12, %v2770_v31  ;;  %v175_v12 = vsub.f32 %v2794_v24, %v1923_v10  ;;  %v2362_v41 = vld [vmem:[#allocation9 + $0x208] sm:$0xff]  }
  0x98   :  { %v523_v16 = vmul.f32 %v522_v3, %v388_v4  ;;  %v525_v18 = vmul.f32 %v468_v30, %v388_v4  ;;  %v340_v31 = vmul.f32 %v1953_v58, %v2800_v19  ;;  %v828_v22 = vmul.f32 %v2001_v50, %v2630_v45  ;;  %v2364_v4 = vld [vmem:[#allocation9 + $0x240] sm:$0xff]  }
  0x99   :  { %1802 = vmatprep.mubr.bf16.mxu1 %v2374_v32  ;;  %v527_v57 = vmul.f32 %v526_v62, %v392_v21  ;;  %vm247_vm12 = vcmp.lt.f32.partialorder %v175_v12, 0.0  ;;  %v2359_v32 = vld [vmem:[#allocation9 + $0x210] sm:$0xff]   ;;  %v530_v19 = vsub.f32 1.0, %v480_v53  ;;  %v610_v23 = vmul.f32 %v1980_v5, %v2725_v48  ;;  %v2357_v48 = vld [vmem:[#allocation9 + $0x298] sm:$0xff]  }
  0x9a   :  { %2218 = vmatpush3.bf16.msra.mxu0 %v2347_v56  ;;  %1803 = vmatmul.mubr.bf16.vlgmr.msra.gmra.mxu1 %v2373_v39  ;;  %v2833_v56 = vmul.f32 %v1991_v49, %v2674_v15  ;;  %v524_v33 = vadd.f32 %v523_v16, %v521_v20  ;;  %v394_v30 = vsub.f32 1.0, %v340_v31  ;;  %vm248_vm13 = vmand %vm246_vm11, %vm247_vm12  ;;  %v393_v39 = vmul.f32 %v1937_v6, %v2811_v34  ;;  %v2360_v16 = vld [vmem:[#allocation9 + $0x290] sm:$0xff]  }
  0x9b   :  { %2219 = vmatprep.subr.bf16.mxu0 %v2349_v42  ;;  %2247 = vmatpush3.bf16.msra.mxu1 %v2345_v40  ;;  %v652_v42 = vsub.f32 1.0, %v2824_v1  ;;  %v528_v29 = vadd.f32 %v527_v57, %v525_v18  ;;  %v764_v40 = vsub.f32 1.0, %v718_v26  ;;  %v1938_v8 = vsel %vm248_vm13, 1.0, %v2493_v55 }
  0x9c   :  { %2248 = vmatprep.subr.bf16.mxu1 %v2493_v55  ;;  %2262 = vmatprep.mubr.msk.bf16.mxu1 %vm2494_vm10, %v2493_v55  ;;  %v649_v24 = vmul.f32 %v648_v35, %v524_v33  ;;  %v651_v27 = vmul.f32 %v598_v52, %v524_v33  ;;  %v768_v45 = vsub.f32 1.0, %v2833_v56  ;;  %v395_v52 = vmul.f32 %v1938_v8, %v394_v30 }
  0x9d   :  { %v653_v25 = vmul.f32 %v652_v42, %v528_v29  ;;  %v870_v14 = vsub.f32 1.0, %v828_v22  ;;  %v869_v49 = vmul.f32 %v2782_v43, %v2790_v44  ;;  %v656_v10 = vsub.f32 1.0, %v610_v23  ;;  %v2365_v43 = vld [vmem:[#allocation9 + $0x200] sm:$0xff]  }
  0x9e   :  { %2220 = vmatpush3.bf16.msra.mxu0 %v2350_v28  ;;  %v2002_v28 = vld [vmem:[#allocation8 + $0x3f] ss:$0 sm:$0xff]  ;;  %v650_v51 = vadd.f32 %v649_v24, %v647_v2  ;;  %v655_v11 = vmul.f32 %v2824_v1, %v528_v29  ;;  %v2363_v1 = vld [vmem:[#allocation9 + $0x288] sm:$0xff]  }
  0x9f   :  { %2221 = vmatprep.subr.bf16.mxu0 %v2352_v37  ;;  %2249 = vmatpush3.bf16.msra.mxu1 %v2348_v54  ;;  %v763_v37 = vmul.f32 %v2773_v9, %v2785_v59  ;;  %v654_v34 = vadd.f32 %v653_v25, %v651_v27  ;;  %v834_v6 = vmul.f32 %v2002_v28, %v2671_v13  ;;  %v1992_v9 = vld [vmem:[#allocation8 + $0x35] ss:$0 sm:$0xff] }
  0xa0   :  { %2250 = vmatprep.subr.bf16.mxu1 %v2493_v55  ;;  %v765_v59 = vmul.f32 %v764_v40, %v650_v51  ;;  %v767_v3 = vmul.f32 %v718_v26, %v650_v51  ;;  %v396_v54 = vadd.f32 %v395_v52, %v393_v39  ;;  %v730_v58 = vmul.f32 %v1992_v9, %v2722_v63 }
  0xa1   :  { %v769_v62 = vmul.f32 %v768_v45, %v654_v34  ;;  %v771_v12 = vmul.f32 %v2833_v56, %v654_v34 }
  0xa2   :  { %2222 = vmatpush3.bf16.msra.mxu0 %v2353_v61  ;;  %v529_v61 = vmul.f32 %v2816_v46, %v392_v21  ;;  %v766_v20 = vadd.f32 %v765_v59, %v763_v37  ;;  %v531_v13 = vmul.f32 %v530_v19, %v396_v54  ;;  %v2003_v46 = vld [vmem:[#allocation8 + $0x40] ss:$0 sm:$0xff] }
  0xa3   :  { %2223 = vmatprep.subr.bf16.mxu0 %v2355_v38  ;;  %2251 = vmatpush3.bf16.msra.mxu1 %v2351_v7  ;;  %v874_v38 = vsub.f32 1.0, %v834_v6  ;;  %v770_v2 = vadd.f32 %v769_v62, %v767_v3  ;;  %v840_v63 = vmul.f32 %v2003_v46, %v2674_v15  ;;  %v2366_v15 = vld [vmem:[#allocation9 + $0x280] sm:$0xff]  }
  0xa4   :  { %2252 = vmatprep.subr.bf16.mxu1 %v2493_v55  ;;  %v871_v21 = vmul.f32 %v870_v14, %v766_v20  ;;  %v873_v35 = vmul.f32 %v828_v22, %v766_v20  ;;  %v532_v47 = vadd.f32 %v531_v13, %v529_v61 }
  0xa5   :  { %v875_v44 = vmul.f32 %v874_v38, %v770_v2  ;;  %v878_v7 = vsub.f32 1.0, %v840_v63  ;;  %v877_v53 = vmul.f32 %v834_v6, %v770_v2 }
  0xa6   :  { %2224 = vmatpush3.bf16.msra.mxu0 %v2356_v60  ;;  %v872_v18 = vadd.f32 %v871_v21, %v869_v49  ;;  %v657_v50 = vmul.f32 %v656_v10, %v532_v47  ;;  %v772_v60 = vsub.f32 1.0, %v730_v58 }
  0xa7   :  { %2225 = vmatprep.subr.bf16.mxu0 %v2358_v17  ;;  %2253 = vmatpush3.bf16.msra.mxu1 %v2354_v0  ;;  %v876_v57 = vadd.f32 %v875_v44, %v873_v35 }
  0xa8   :  { %2254 = vmatprep.subr.bf16.mxu1 %v2493_v55  ;;  %v658_v42 = vadd.f32 %v657_v50, %v655_v11  ;;  %v2375_v17 = vpack.c.bf16 %v872_v18, %v872_v18 }
  0xa9   :  { %v2376_v33 = vpack.c.bf16 %v876_v57, %v876_v57 }
  0xaa   :  { %2226 = vmatpush3.bf16.msra.mxu0 %v2359_v32  ;;  %v773_v31 = vmul.f32 %v772_v60, %v658_v42 }
  0xab   :  { %2227 = vmatprep.subr.bf16.mxu0 %v2361_v36  ;;  %2255 = vmatpush3.bf16.msra.mxu1 %v2357_v48 }
  0xac   :  { %2256 = vmatprep.subr.bf16.mxu1 %v2493_v55  ;;  %v774_v26 = vadd.f32 %v773_v31, %v771_v12  ;;  %1842 = vmatprep.mubr.bf16.mxu0 %v2376_v33 }
  0xae   :  { %2228 = vmatpush3.bf16.msra.mxu0 %v2362_v41  ;;  %v879_v29 = vmul.f32 %v878_v7, %v774_v26 }
  0xaf   :  { %2229 = vmatprep.subr.bf16.mxu0 %v2364_v4  ;;  %2257 = vmatpush3.bf16.msra.mxu1 %v2360_v16 }
  0xb0   :  { %2258 = vmatprep.subr.bf16.mxu1 %v2493_v55  ;;  %v880_v22 = vadd.f32 %v879_v29, %v877_v53 }
  0xb2   :  { %2230 = vmatpush3.bf16.msra.mxu0 %v2365_v43  ;;  %v899_v56 = vpack.c.bf16 %v880_v22, %v880_v22 }
  0xb3   :  { %2259 = vmatpush3.bf16.msra.mxu1 %v2363_v1 }
  0xb4   :  { %2260 = vmatprep.subr.bf16.mxu1 %v2493_v55  ;;  %900 = vst [vmem:[#allocation2 + $0x28] sm:$0xf] %v899_v56 }
  0xb5   :  { %1843 = vmatmul.mubr.bf16.vlgmr.msra.gmra.mxu0 %v2375_v17 }
  0xb7   :  { %2261 = vmatpush3.bf16.msra.mxu1 %v2366_v15 }
  0xbb   :  { %v2367_v30 = vld [vmem:[#allocation2 + $0x28] ss:$0 sps:$4 sm:$0xff]  }
  0xbc   :  { %2263 = vmatmul.mubr.bf16.vlgmr.msra.gmra.mxu1 %v2367_v30 }
 0x135   :  { %v2143_v5 = vpop.f32.mrf.mxu0 }
 0x137   :  { %v2144_v24 = vpop.f32.mrf.mxu0  ;;  %v2165_v39 = vpop.f32.mrf.mxu1 }
 0x138   :  { %v2145_v27 = vadd.f32 %v2144_v24, %v2143_v5 }
 0x139   :  { %v2146_v40 = vpop.f32.mrf.mxu0  ;;  %v2166_v32 = vpop.f32.mrf.mxu1 }
 0x13a   :  { %v2167_v25 = vadd.f32 %v2166_v32, %v2165_v39 }
 0x13b   :  { %v2147_v28 = vpop.f32.mrf.mxu0  ;;  %v2168_v37 = vpop.f32.mrf.mxu1 }
 0x13c   :  { %v1725_v45 = vadd.f32 %v2167_v25, %v2145_v27 }
 0x13d   :  { %v2169_v8 = vpop.f32.mrf.mxu1 }
 0x155   :  { %v2187_v0 = vpop.f32.mrf.mxu0 }
 0x157   :  { %v2188_v36 = vpop.f32.mrf.mxu0 }
 0x158   :  { %v2189_v14 = vadd.f32 %v2188_v36, %v2187_v0 }
 0x159   :  { %v2190_v55 = vpop.f32.mrf.mxu0 }
 0x15a   :  { %v2209_v52 = vpop.f32.mrf.mxu1  ;;  %v1765_v3 = vadd.f32 %v2189_v14, %v1725_v45 }
 0x15b   :  { %v2191_v51 = vpop.f32.mrf.mxu0 }
 0x15c   :  { %v2210_v19 = vpop.f32.mrf.mxu1 }
 0x15d   :  { %v2211_v54 = vadd.f32 %v2210_v19, %v2209_v52 }
 0x15e   :  { %v2212_v23 = vpop.f32.mrf.mxu1 }
 0x15f   :  { %v1805_v62 = vadd.f32 %v2211_v54, %v1765_v3 }
 0x160   :  { %v2213_v34 = vpop.f32.mrf.mxu1 }
 0x175   :  { %v2231_v6 = vpop.f32.mrf.mxu0 }
 0x177   :  { %v2232_v9 = vpop.f32.mrf.mxu0 }
 0x178   :  { %v2233_v41 = vadd.f32 %v2232_v9, %v2231_v6 }
 0x179   :  { %v2234_v59 = vpop.f32.mrf.mxu0 }
 0x17a   :  { %v1845_v49 = vadd.f32 %v2233_v41, %v1805_v62 }
 0x17b   :  { %v2235_v61 = vpop.f32.mrf.mxu0 }
 0x17c   :  { %v1884_v38 = vpop.f32.mrf.mxu1 }
 0x17d   :  { %v1885_v48 = vadd.f32 %v1884_v38, %v1845_v49 }
 0x17e   :  { %v2264_v4 = vpop.f32.mrf.mxu1 }
 0x17f   :  { %1890 = vst [vmem:[#allocation11] sm:$0xff] %v1885_v48 }
 0x180   :  { %v1887_v20 = vpop.f32.mrf.mxu1 }
 0x181   :  { %2468 = shalt.err (!%p2465_p10)
}
 0x182   :  { %1900 = dma.vmem_to_hbm [thread:$0]  %s1898_s3, 128, %s2871_s4, [#allocation5]   ;;  %v2265_v13 = vpop.f32.mrf.mxu1 }
 0x183   :  { %2483 = dma.done.wait [#allocation5], 128  }
 0x184   :  { %2484 = vsyncadd [#allocation5], 4294967168 }
 0x185   :  { %1904 = vsyncpa [#allocation4], 1 }
 0x186   :  { %1905 = vsyncpa [#allocation7], 1 }
 0x187   :  { %1906 = vsyncpa [#allocation10], 1 }
 0x188   :  { %1907 = vsyncpa [#allocation5], 1 }

</bundles_post_ra>
